<compile_context>
chip_gen: v7x
topology: tpu7x:2x2x1
jax: 0.10.0
libtpu: 0.0.40
codegen_flags: <defaults>
</compile_context>

<pallas_src>
import functools
import math

import jax
import jax.numpy as jnp
from jax.experimental import pallas as pl
from jax.experimental.pallas import tpu as pltpu


def _pick_tile(dim, target, align):
    """Largest tile <= target that divides dim and is a multiple of align, else full dim."""
    if dim <= target:
        return dim
    for cand in range(target, align - 1, -align):
        if dim % cand == 0:
            return cand
    return dim


def _ln(y, g, b, eps):
    mu = jnp.mean(y, axis=-1, keepdims=True)
    var = jnp.mean(jnp.square(y - mu), axis=-1, keepdims=True)
    return (y - mu) * jax.lax.rsqrt(var + eps) * g + b


# ----------------------------- fused Pallas kernel --------------------------

def _encoder_stack_kernel(x_ref, w_in_ref, b_in_ref,
                          w_qkv_ref, b_qkv_ref, w_o_ref, b_o_ref,
                          w_ff1_ref, b_ff1_ref, w_ff2_ref, b_ff2_ref,
                          g1_ref, be1_ref, g2_ref, be2_ref,
                          w_out_ref, b_out_ref,
                          out_ref, h_ref,
                          *, nhead, ff_chunk, eps):
    """Grid = (B, nlayers). One batch per program (axis 0, parallel), layers in order
    (axis 1, arbitrary). h_ref is the (L, E) f32 activation carried across layer steps."""
    l = pl.program_id(1)
    L, E = h_ref.shape
    Dh = E // nhead
    scale = 1.0 / math.sqrt(Dh)
    FF = w_ff1_ref.shape[2]
    bf = jnp.bfloat16

    # ---- input linear (fused into the first layer step) ----
    @pl.when(l == 0)
    def _():
        h_ref[...] = (jnp.dot(x_ref[0].astype(bf), w_in_ref[...],
                              preferred_element_type=jnp.float32) + b_in_ref[...])

    h = h_ref[...]                                                     # (L, E) f32

    # ---- multi-head self-attention (post-norm block) ----
    qkv = (jnp.dot(h.astype(bf), w_qkv_ref[0],
                   preferred_element_type=jnp.float32) + b_qkv_ref[0])  # (L, 3E)

    head_outs = []
    for hi in range(nhead):                                            # static loop over heads
        q = qkv[:, hi * Dh:(hi + 1) * Dh].astype(bf)
        k = qkv[:, E + hi * Dh:E + (hi + 1) * Dh].astype(bf)
        v = qkv[:, 2 * E + hi * Dh:2 * E + (hi + 1) * Dh].astype(bf)
        s = jax.lax.dot_general(q, k, (((1,), (1,)), ((), ())),
                                preferred_element_type=jnp.float32) * scale   # (L, L)
        s = s - jnp.max(s, axis=-1, keepdims=True)
        p = jnp.exp(s)
        p = p / jnp.sum(p, axis=-1, keepdims=True)                    # exact softmax
        head_outs.append(jnp.dot(p.astype(bf), v,
                                 preferred_element_type=jnp.float32))  # (L, Dh)
    attn = jnp.concatenate(head_outs, axis=-1)                         # (L, E)

    y = (jnp.dot(attn.astype(bf), w_o_ref[0],
                 preferred_element_type=jnp.float32) + b_o_ref[0] + h)
    h1 = _ln(y, g1_ref[0], be1_ref[0], eps)

    # ---- feed-forward block; FF dim processed in chunks (live value stays small) ----
    h1b = h1.astype(bf)
    ff = jnp.zeros((L, E), jnp.float32)
    for f0 in range(0, FF, ff_chunk):
        a = (jnp.dot(h1b, w_ff1_ref[0, :, f0:f0 + ff_chunk],
                     preferred_element_type=jnp.float32)
             + b_ff1_ref[0, :, f0:f0 + ff_chunk])
        a = jnp.maximum(a, 0.0)
        ff = ff + jnp.dot(a.astype(bf), w_ff2_ref[0, f0:f0 + ff_chunk, :],
                          preferred_element_type=jnp.float32)
    h2 = _ln(h1 + ff + b_ff2_ref[0], g2_ref[0], be2_ref[0], eps)
    h_ref[...] = h2

    # ---- output linear (fused into the last layer step) ----
    @pl.when(l == pl.num_programs(1) - 1)
    def _():
        out_ref[0] = (jnp.dot(h2.astype(bf), w_out_ref[...],
                              preferred_element_type=jnp.float32)
                      + b_out_ref[...]).astype(out_ref.dtype)


def pallas_forward(x, params, eps=1e-5):
    B, L, F = x.shape
    E, H, NL = params["E"], params["nhead"], params["nlayers"]
    FF = params["w_ff1"].shape[2]
    ff_chunk = _pick_tile(FF, 512, 128)

    def _nbytes(a):
        return a.size * jnp.dtype(a.dtype).itemsize

    layer_keys = ("w_qkv", "b_qkv", "w_o", "b_o", "w_ff1", "b_ff1",
                  "w_ff2", "b_ff2", "g1", "be1", "g2", "be2")
    per_layer = sum(_nbytes(params[k]) // NL for k in layer_keys)
    static = sum(_nbytes(params[k]) for k in ("w_in", "b_in", "w_out", "b_out"))
    io_block = 2 * (L * F * 4)
    # double-buffered blocks + static weights + slack; capped at 32 MiB for v7x headroom.
    vmem_limit = int(min(32 * 2**20,
                         max(8 * 2**20, 2 * per_layer + 2 * static + 2 * io_block + 4 * 2**20)))

    layer_spec = lambda arr: pl.BlockSpec((1,) + arr.shape[1:], lambda b, l: (l, 0, 0))
    shared_spec = lambda arr: pl.BlockSpec(arr.shape, lambda b, l: (0, 0))

    out = pl.pallas_call(
        functools.partial(_encoder_stack_kernel, nhead=H, ff_chunk=ff_chunk, eps=eps),
        grid=(B, NL),
        in_specs=[
            pl.BlockSpec((1, L, F), lambda b, l: (b, 0, 0)),   # x
            shared_spec(params["w_in"]), shared_spec(params["b_in"]),
            layer_spec(params["w_qkv"]), layer_spec(params["b_qkv"]),
            layer_spec(params["w_o"]), layer_spec(params["b_o"]),
            layer_spec(params["w_ff1"]), layer_spec(params["b_ff1"]),
            layer_spec(params["w_ff2"]), layer_spec(params["b_ff2"]),
            layer_spec(params["g1"]), layer_spec(params["be1"]),
            layer_spec(params["g2"]), layer_spec(params["be2"]),
            shared_spec(params["w_out"]), shared_spec(params["b_out"]),
        ],
        out_specs=pl.BlockSpec((1, L, F), lambda b, l: (b, 0, 0)),
        out_shape=jax.ShapeDtypeStruct((B, L, F), jnp.float32),
        scratch_shapes=[pltpu.VMEM((L, E), jnp.float32)],
        compiler_params=pltpu.CompilerParams(
            dimension_semantics=("parallel", "arbitrary"),
            vmem_limit_bytes=vmem_limit),
    )(x,
      params["w_in"], params["b_in"],
      params["w_qkv"], params["b_qkv"], params["w_o"], params["b_o"],
      params["w_ff1"], params["b_ff1"], params["w_ff2"], params["b_ff2"],
      params["g1"], params["be1"], params["g2"], params["be2"],
      params["w_out"], params["b_out"])
    return out


# ----------------------------- parameter init -------------------------------

def _dense_init(key, fan_in, fan_out):
    """PyTorch-nn.Linear-style uniform init; weights stored bf16 for the MXU."""
    kw, kb = jax.random.split(key)
    lim = 1.0 / math.sqrt(fan_in)
    w = jax.random.uniform(kw, (fan_in, fan_out), jnp.float32, -lim, lim)
    b = jax.random.uniform(kb, (1, fan_out), jnp.float32, -lim, lim)
    return w.astype(jnp.bfloat16), b


def init_params(key, num_features, E, nlayers, nhead, dim_feedforward):
    keys = jax.random.split(key, 2 + nlayers)
    params = {"E": E, "nhead": nhead, "nlayers": nlayers}
    params["w_in"], params["b_in"] = _dense_init(keys[0], num_features, E)
    params["w_out"], params["b_out"] = _dense_init(keys[1], E, num_features)

    per = {k: [] for k in ("w_qkv", "b_qkv", "w_o", "b_o", "w_ff1", "b_ff1",
                           "w_ff2", "b_ff2", "g1", "be1", "g2", "be2")}
    for li in range(nlayers):
        lk = jax.random.split(keys[2 + li], 4)
        w_qkv, b_qkv = _dense_init(lk[0], E, 3 * E)        # MHA in_proj (stored transposed)
        w_o, b_o = _dense_init(lk[1], E, E)                # MHA out_proj
        w_ff1, b_ff1 = _dense_init(lk[2], E, dim_feedforward)
        w_ff2, b_ff2 = _dense_init(lk[3], dim_feedforward, E)
        per["w_qkv"].append(w_qkv); per["b_qkv"].append(b_qkv)
        per["w_o"].append(w_o); per["b_o"].append(b_o)
        per["w_ff1"].append(w_ff1); per["b_ff1"].append(b_ff1)
        per["w_ff2"].append(w_ff2); per["b_ff2"].append(b_ff2)
        per["g1"].append(jnp.ones((1, E), jnp.float32))
        per["be1"].append(jnp.zeros((1, E), jnp.float32))
        per["g2"].append(jnp.ones((1, E), jnp.float32))
        per["be2"].append(jnp.zeros((1, E), jnp.float32))
    for k, v in per.items():
        params[k] = jnp.stack(v, axis=0)                   # (nlayers, ...)
    return params


# ----------------------------- pure-JAX reference ---------------------------

def _ln_ref(y, g, b, eps=1e-5):
    mu = jnp.mean(y, axis=-1, keepdims=True)
    var = jnp.mean(jnp.square(y - mu), axis=-1, keepdims=True)
    return (y - mu) * jax.lax.rsqrt(var + eps) * g + b


def reference_forward(x, params):
    """Pure-JAX reference performing the same bf16-operand / f32-accumulate math."""
    B, L, F = x.shape
    E, H, NL = params["E"], params["nhead"], params["nlayers"]
    Dh = E // H
    scale = 1.0 / math.sqrt(Dh)
    bf = jnp.bfloat16

    def lin(t, w, b):
        return jnp.dot(t.astype(bf), w, preferred_element_type=jnp.float32) + b

    h = lin(x.reshape(B * L, F), params["w_in"], params["b_in"])
    for li in range(NL):
        qkv = lin(h, params["w_qkv"][li], params["b_qkv"][li]).reshape(B, L, 3 * E)
        q, k, v = jnp.split(qkv, 3, axis=-1)
        hd = lambda t: t.reshape(B, L, H, Dh).transpose(0, 2, 1, 3).astype(bf)
        s = jnp.einsum("bhqd,bhkd->bhqk", hd(q), hd(k),
                       preferred_element_type=jnp.float32) * scale
        p = jax.nn.softmax(s, axis=-1)
        o = jnp.einsum("bhqk,bhkd->bhqd", p.astype(bf), hd(v),
                       preferred_element_type=jnp.float32)
        o = o.transpose(0, 2, 1, 3).reshape(B * L, E)
        h = _ln_ref(lin(o, params["w_o"][li], params["b_o"][li]) + h,
                    params["g1"][li], params["be1"][li])
        a = jnp.maximum(lin(h, params["w_ff1"][li], params["b_ff1"][li]), 0.0)
        ff = jnp.dot(a.astype(bf), params["w_ff2"][li],
                     preferred_element_type=jnp.float32) + params["b_ff2"][li]
        h = _ln_ref(h + ff, params["g2"][li], params["be2"][li])
    out = lin(h, params["w_out"], params["b_out"])
    return out.reshape(B, L, F)


# ---------------------------------- main -------------------------------------

if __name__ == "__main__":
    # Small shapes consistent with the module's (B, L, num_features) input.
    B, L, NUM_FEATURES = 2, 8, 16
    E, NLAYERS, NHEAD = 32, 2, 4
    DIM_FEEDFORWARD = 2048  # nn.TransformerEncoderLayer default

    key = jax.random.PRNGKey(0)
    kx, kp = jax.random.split(key)
    x = jax.random.normal(kx, (B, L, NUM_FEATURES), jnp.float32)
    params = init_params(kp, NUM_FEATURES, E, NLAYERS, NHEAD, DIM_FEEDFORWARD)

    out = pallas_forward(x, params)
    out = jax.block_until_ready(out)
    assert out.shape == (B, L, NUM_FEATURES)

    ref = jax.block_until_ready(reference_forward(x, params))
    if not jnp.allclose(out, ref, atol=2e-2, rtol=2e-2):
        raise AssertionError("Pallas output does not match pure-JAX reference")

    print("KERNEL_OK")
</pallas_src>

<mosaic_0001>
module attributes {stable_mosaic.version = 11 : i64} {
  func.func @_encoder_stack_kernel(%arg0: i32, %arg1: i32, %arg2: memref<1x8x16xf32, #tpu.memory_space<vmem>>, %arg3: memref<16x32xbf16, #tpu.memory_space<vmem>>, %arg4: memref<1x32xf32, #tpu.memory_space<vmem>>, %arg5: memref<1x32x96xbf16, #tpu.memory_space<vmem>>, %arg6: memref<1x1x96xf32, #tpu.memory_space<vmem>>, %arg7: memref<1x32x32xbf16, #tpu.memory_space<vmem>>, %arg8: memref<1x1x32xf32, #tpu.memory_space<vmem>>, %arg9: memref<1x32x2048xbf16, #tpu.memory_space<vmem>>, %arg10: memref<1x1x2048xf32, #tpu.memory_space<vmem>>, %arg11: memref<1x2048x32xbf16, #tpu.memory_space<vmem>>, %arg12: memref<1x1x32xf32, #tpu.memory_space<vmem>>, %arg13: memref<1x1x32xf32, #tpu.memory_space<vmem>>, %arg14: memref<1x1x32xf32, #tpu.memory_space<vmem>>, %arg15: memref<1x1x32xf32, #tpu.memory_space<vmem>>, %arg16: memref<1x1x32xf32, #tpu.memory_space<vmem>>, %arg17: memref<32x16xbf16, #tpu.memory_space<vmem>>, %arg18: memref<1x16xf32, #tpu.memory_space<vmem>>, %arg19: memref<1x8x16xf32, #tpu.memory_space<vmem>>, %arg20: memref<8x32xf32, #tpu.memory_space<vmem>>) attributes {dimension_semantics = [#tpu.dimension_semantics<parallel>, #tpu.dimension_semantics<arbitrary>], iteration_bounds = array<i64: 2, 2>, scalar_prefetch = 0 : i64, scratch_operands = 1 : i64, tpu.core_type = #tpu.core_type<tc>, window_params = [{transform_indices = @transform_0, window_bounds = array<i64: 1, 8, 16>}, {pipeline_mode = #tpu.pipeline_mode<synchronous>, transform_indices = @transform_1, window_bounds = array<i64: 16, 32>}, {pipeline_mode = #tpu.pipeline_mode<synchronous>, transform_indices = @transform_2, window_bounds = array<i64: 1, 32>}, {transform_indices = @transform_3, window_bounds = array<i64: 1, 32, 96>}, {transform_indices = @transform_4, window_bounds = array<i64: 1, 1, 96>}, {transform_indices = @transform_5, window_bounds = array<i64: 1, 32, 32>}, {transform_indices = @transform_6, window_bounds = array<i64: 1, 1, 32>}, {transform_indices = @transform_7, window_bounds = array<i64: 1, 32, 2048>}, {transform_indices = @transform_8, window_bounds = array<i64: 1, 1, 2048>}, {transform_indices = @transform_9, window_bounds = array<i64: 1, 2048, 32>}, {transform_indices = @transform_10, window_bounds = array<i64: 1, 1, 32>}, {transform_indices = @transform_11, window_bounds = array<i64: 1, 1, 32>}, {transform_indices = @transform_12, window_bounds = array<i64: 1, 1, 32>}, {transform_indices = @transform_13, window_bounds = array<i64: 1, 1, 32>}, {transform_indices = @transform_14, window_bounds = array<i64: 1, 1, 32>}, {pipeline_mode = #tpu.pipeline_mode<synchronous>, transform_indices = @transform_15, window_bounds = array<i64: 32, 16>}, {pipeline_mode = #tpu.pipeline_mode<synchronous>, transform_indices = @transform_16, window_bounds = array<i64: 1, 16>}, {transform_indices = @transform_17, window_bounds = array<i64: 1, 8, 16>}]} {
    %c0_i32 = arith.constant 0 : i32
    %0 = arith.cmpi eq, %arg1, %c0_i32 : i32
    %1 = arith.extui %0 : i1 to i32
    %c0_i32_0 = arith.constant 0 : i32
    %2 = arith.cmpi ne, %1, %c0_i32_0 : i32
    scf.if %2 {
      %c0_109 = arith.constant 0 : index
      %c0_110 = arith.constant 0 : index
      %c0_111 = arith.constant 0 : index
      %221 = vector.load %arg2[%c0_109, %c0_110, %c0_111] : memref<1x8x16xf32, #tpu.memory_space<vmem>>, vector<1x8x16xf32>
      %222 = vector.shape_cast %221 : vector<1x8x16xf32> to vector<8x16xf32>
      %223 = arith.truncf %222 : vector<8x16xf32> to vector<8x16xbf16>
      %c0_112 = arith.constant 0 : index
      %c0_113 = arith.constant 0 : index
      %224 = vector.load %arg3[%c0_112, %c0_113] : memref<16x32xbf16, #tpu.memory_space<vmem>>, vector<16x32xbf16>
      %cst_114 = arith.constant dense<0.000000e+00> : vector<8x32xf32>
      %225 = tpu.matmul %223, %224, %cst_114 {dimension_numbers = #tpu.dot_dimension_numbers<[1], [0], [0], [1], [0, 0, 1, 1], [], []>} : vector<8x16xbf16>, vector<16x32xbf16>, vector<8x32xf32> -> vector<8x32xf32>
      %c0_115 = arith.constant 0 : index
      %c0_116 = arith.constant 0 : index
      %226 = vector.load %arg4[%c0_115, %c0_116] : memref<1x32xf32, #tpu.memory_space<vmem>>, vector<1x32xf32>
      %227 = vector.broadcast %226 : vector<1x32xf32> to vector<8x32xf32>
      %228 = arith.addf %225, %227 : vector<8x32xf32>
      %c0_117 = arith.constant 0 : index
      %c0_118 = arith.constant 0 : index
      %229 = vector.load %arg20[%c0_117, %c0_118] : memref<8x32xf32, #tpu.memory_space<vmem>>, vector<8x32xf32>
      tpu.vector_store %arg20[%c0_117, %c0_118], %228 {strides = array<i32>} : memref<8x32xf32, #tpu.memory_space<vmem>>, vector<8x32xf32>,
    } else {
    }
    %c0 = arith.constant 0 : index
    %c0_1 = arith.constant 0 : index
    %3 = vector.load %arg20[%c0, %c0_1] : memref<8x32xf32, #tpu.memory_space<vmem>>, vector<8x32xf32>
    %4 = arith.truncf %3 : vector<8x32xf32> to vector<8x32xbf16>
    %c0_2 = arith.constant 0 : index
    %c0_3 = arith.constant 0 : index
    %c0_4 = arith.constant 0 : index
    %5 = vector.load %arg5[%c0_2, %c0_3, %c0_4] : memref<1x32x96xbf16, #tpu.memory_space<vmem>>, vector<1x32x96xbf16>
    %6 = vector.shape_cast %5 : vector<1x32x96xbf16> to vector<32x96xbf16>
    %cst = arith.constant dense<0.000000e+00> : vector<8x96xf32>
    %7 = tpu.matmul %4, %6, %cst {dimension_numbers = #tpu.dot_dimension_numbers<[1], [0], [0], [1], [0, 0, 1, 1], [], []>} : vector<8x32xbf16>, vector<32x96xbf16>, vector<8x96xf32> -> vector<8x96xf32>
    %c0_5 = arith.constant 0 : index
    %c0_6 = arith.constant 0 : index
    %c0_7 = arith.constant 0 : index
    %8 = vector.load %arg6[%c0_5, %c0_6, %c0_7] : memref<1x1x96xf32, #tpu.memory_space<vmem>>, vector<1x1x96xf32>
    %9 = vector.shape_cast %8 : vector<1x1x96xf32> to vector<1x96xf32>
    %10 = vector.broadcast %9 : vector<1x96xf32> to vector<8x96xf32>
    %11 = arith.addf %7, %10 : vector<8x96xf32>
    %12 = vector.extract_strided_slice %11 {offsets = [0, 0], sizes = [8, 8], strides = [1, 1]} : vector<8x96xf32> to vector<8x8xf32>
    %13 = arith.truncf %12 : vector<8x8xf32> to vector<8x8xbf16>
    %14 = vector.extract_strided_slice %11 {offsets = [0, 32], sizes = [8, 8], strides = [1, 1]} : vector<8x96xf32> to vector<8x8xf32>
    %15 = arith.truncf %14 : vector<8x8xf32> to vector<8x8xbf16>
    %16 = vector.extract_strided_slice %11 {offsets = [0, 64], sizes = [8, 8], strides = [1, 1]} : vector<8x96xf32> to vector<8x8xf32>
    %17 = arith.truncf %16 : vector<8x8xf32> to vector<8x8xbf16>
    %cst_8 = arith.constant dense<0.000000e+00> : vector<8x8xf32>
    %18 = tpu.matmul %13, %15, %cst_8 {dimension_numbers = #tpu.dot_dimension_numbers<[1], [1], [0], [0], [0, 0, 1, 0], [], []>} : vector<8x8xbf16>, vector<8x8xbf16>, vector<8x8xf32> -> vector<8x8xf32>
    %cst_9 = arith.constant 0.353553385 : f32
    %19 = vector.broadcast %cst_9 : f32 to vector<8x8xf32>
    %20 = arith.mulf %18, %19 : vector<8x8xf32>
    %cst_10 = arith.constant dense<0xFF800000> : vector<8xf32>
    %21 = vector.multi_reduction <maximumf>, %20, %cst_10 [1] : vector<8x8xf32> to vector<8xf32>
    %22 = vector.shape_cast %21 : vector<8xf32> to vector<8x1xf32>
    %23 = vector.broadcast %22 : vector<8x1xf32> to vector<8x8xf32>
    %24 = arith.subf %20, %23 : vector<8x8xf32>
    %25 = math.exp %24 : vector<8x8xf32>
    %cst_11 = arith.constant dense<0.000000e+00> : vector<8xf32>
    %26 = vector.multi_reduction <add>, %25, %cst_11 [1] : vector<8x8xf32> to vector<8xf32>
    %27 = vector.shape_cast %26 : vector<8xf32> to vector<8x1xf32>
    %28 = vector.broadcast %27 : vector<8x1xf32> to vector<8x8xf32>
    %29 = arith.divf %25, %28 : vector<8x8xf32>
    %30 = arith.truncf %29 : vector<8x8xf32> to vector<8x8xbf16>
    %cst_12 = arith.constant dense<0.000000e+00> : vector<8x8xf32>
    %31 = tpu.matmul %30, %17, %cst_12 {dimension_numbers = #tpu.dot_dimension_numbers<[1], [0], [0], [1], [0, 0, 1, 1], [], []>} : vector<8x8xbf16>, vector<8x8xbf16>, vector<8x8xf32> -> vector<8x8xf32>
    %32 = vector.extract_strided_slice %11 {offsets = [0, 8], sizes = [8, 8], strides = [1, 1]} : vector<8x96xf32> to vector<8x8xf32>
    %33 = arith.truncf %32 : vector<8x8xf32> to vector<8x8xbf16>
    %34 = vector.extract_strided_slice %11 {offsets = [0, 40], sizes = [8, 8], strides = [1, 1]} : vector<8x96xf32> to vector<8x8xf32>
    %35 = arith.truncf %34 : vector<8x8xf32> to vector<8x8xbf16>
    %36 = vector.extract_strided_slice %11 {offsets = [0, 72], sizes = [8, 8], strides = [1, 1]} : vector<8x96xf32> to vector<8x8xf32>
    %37 = arith.truncf %36 : vector<8x8xf32> to vector<8x8xbf16>
    %cst_13 = arith.constant dense<0.000000e+00> : vector<8x8xf32>
    %38 = tpu.matmul %33, %35, %cst_13 {dimension_numbers = #tpu.dot_dimension_numbers<[1], [1], [0], [0], [0, 0, 1, 0], [], []>} : vector<8x8xbf16>, vector<8x8xbf16>, vector<8x8xf32> -> vector<8x8xf32>
    %cst_14 = arith.constant 0.353553385 : f32
    %39 = vector.broadcast %cst_14 : f32 to vector<8x8xf32>
    %40 = arith.mulf %38, %39 : vector<8x8xf32>
    %cst_15 = arith.constant dense<0xFF800000> : vector<8xf32>
    %41 = vector.multi_reduction <maximumf>, %40, %cst_15 [1] : vector<8x8xf32> to vector<8xf32>
    %42 = vector.shape_cast %41 : vector<8xf32> to vector<8x1xf32>
    %43 = vector.broadcast %42 : vector<8x1xf32> to vector<8x8xf32>
    %44 = arith.subf %40, %43 : vector<8x8xf32>
    %45 = math.exp %44 : vector<8x8xf32>
    %cst_16 = arith.constant dense<0.000000e+00> : vector<8xf32>
    %46 = vector.multi_reduction <add>, %45, %cst_16 [1] : vector<8x8xf32> to vector<8xf32>
    %47 = vector.shape_cast %46 : vector<8xf32> to vector<8x1xf32>
    %48 = vector.broadcast %47 : vector<8x1xf32> to vector<8x8xf32>
    %49 = arith.divf %45, %48 : vector<8x8xf32>
    %50 = arith.truncf %49 : vector<8x8xf32> to vector<8x8xbf16>
    %cst_17 = arith.constant dense<0.000000e+00> : vector<8x8xf32>
    %51 = tpu.matmul %50, %37, %cst_17 {dimension_numbers = #tpu.dot_dimension_numbers<[1], [0], [0], [1], [0, 0, 1, 1], [], []>} : vector<8x8xbf16>, vector<8x8xbf16>, vector<8x8xf32> -> vector<8x8xf32>
    %52 = vector.extract_strided_slice %11 {offsets = [0, 16], sizes = [8, 8], strides = [1, 1]} : vector<8x96xf32> to vector<8x8xf32>
    %53 = arith.truncf %52 : vector<8x8xf32> to vector<8x8xbf16>
    %54 = vector.extract_strided_slice %11 {offsets = [0, 48], sizes = [8, 8], strides = [1, 1]} : vector<8x96xf32> to vector<8x8xf32>
    %55 = arith.truncf %54 : vector<8x8xf32> to vector<8x8xbf16>
    %56 = vector.extract_strided_slice %11 {offsets = [0, 80], sizes = [8, 8], strides = [1, 1]} : vector<8x96xf32> to vector<8x8xf32>
    %57 = arith.truncf %56 : vector<8x8xf32> to vector<8x8xbf16>
    %cst_18 = arith.constant dense<0.000000e+00> : vector<8x8xf32>
    %58 = tpu.matmul %53, %55, %cst_18 {dimension_numbers = #tpu.dot_dimension_numbers<[1], [1], [0], [0], [0, 0, 1, 0], [], []>} : vector<8x8xbf16>, vector<8x8xbf16>, vector<8x8xf32> -> vector<8x8xf32>
    %cst_19 = arith.constant 0.353553385 : f32
    %59 = vector.broadcast %cst_19 : f32 to vector<8x8xf32>
    %60 = arith.mulf %58, %59 : vector<8x8xf32>
    %cst_20 = arith.constant dense<0xFF800000> : vector<8xf32>
    %61 = vector.multi_reduction <maximumf>, %60, %cst_20 [1] : vector<8x8xf32> to vector<8xf32>
    %62 = vector.shape_cast %61 : vector<8xf32> to vector<8x1xf32>
    %63 = vector.broadcast %62 : vector<8x1xf32> to vector<8x8xf32>
    %64 = arith.subf %60, %63 : vector<8x8xf32>
    %65 = math.exp %64 : vector<8x8xf32>
    %cst_21 = arith.constant dense<0.000000e+00> : vector<8xf32>
    %66 = vector.multi_reduction <add>, %65, %cst_21 [1] : vector<8x8xf32> to vector<8xf32>
    %67 = vector.shape_cast %66 : vector<8xf32> to vector<8x1xf32>
    %68 = vector.broadcast %67 : vector<8x1xf32> to vector<8x8xf32>
    %69 = arith.divf %65, %68 : vector<8x8xf32>
    %70 = arith.truncf %69 : vector<8x8xf32> to vector<8x8xbf16>
    %cst_22 = arith.constant dense<0.000000e+00> : vector<8x8xf32>
    %71 = tpu.matmul %70, %57, %cst_22 {dimension_numbers = #tpu.dot_dimension_numbers<[1], [0], [0], [1], [0, 0, 1, 1], [], []>} : vector<8x8xbf16>, vector<8x8xbf16>, vector<8x8xf32> -> vector<8x8xf32>
    %72 = vector.extract_strided_slice %11 {offsets = [0, 24], sizes = [8, 8], strides = [1, 1]} : vector<8x96xf32> to vector<8x8xf32>
    %73 = arith.truncf %72 : vector<8x8xf32> to vector<8x8xbf16>
    %74 = vector.extract_strided_slice %11 {offsets = [0, 56], sizes = [8, 8], strides = [1, 1]} : vector<8x96xf32> to vector<8x8xf32>
    %75 = arith.truncf %74 : vector<8x8xf32> to vector<8x8xbf16>
    %76 = vector.extract_strided_slice %11 {offsets = [0, 88], sizes = [8, 8], strides = [1, 1]} : vector<8x96xf32> to vector<8x8xf32>
    %77 = arith.truncf %76 : vector<8x8xf32> to vector<8x8xbf16>
    %cst_23 = arith.constant dense<0.000000e+00> : vector<8x8xf32>
    %78 = tpu.matmul %73, %75, %cst_23 {dimension_numbers = #tpu.dot_dimension_numbers<[1], [1], [0], [0], [0, 0, 1, 0], [], []>} : vector<8x8xbf16>, vector<8x8xbf16>, vector<8x8xf32> -> vector<8x8xf32>
    %cst_24 = arith.constant 0.353553385 : f32
    %79 = vector.broadcast %cst_24 : f32 to vector<8x8xf32>
    %80 = arith.mulf %78, %79 : vector<8x8xf32>
    %cst_25 = arith.constant dense<0xFF800000> : vector<8xf32>
    %81 = vector.multi_reduction <maximumf>, %80, %cst_25 [1] : vector<8x8xf32> to vector<8xf32>
    %82 = vector.shape_cast %81 : vector<8xf32> to vector<8x1xf32>
    %83 = vector.broadcast %82 : vector<8x1xf32> to vector<8x8xf32>
    %84 = arith.subf %80, %83 : vector<8x8xf32>
    %85 = math.exp %84 : vector<8x8xf32>
    %cst_26 = arith.constant dense<0.000000e+00> : vector<8xf32>
    %86 = vector.multi_reduction <add>, %85, %cst_26 [1] : vector<8x8xf32> to vector<8xf32>
    %87 = vector.shape_cast %86 : vector<8xf32> to vector<8x1xf32>
    %88 = vector.broadcast %87 : vector<8x1xf32> to vector<8x8xf32>
    %89 = arith.divf %85, %88 : vector<8x8xf32>
    %90 = arith.truncf %89 : vector<8x8xf32> to vector<8x8xbf16>
    %cst_27 = arith.constant dense<0.000000e+00> : vector<8x8xf32>
    %91 = tpu.matmul %90, %77, %cst_27 {dimension_numbers = #tpu.dot_dimension_numbers<[1], [0], [0], [1], [0, 0, 1, 1], [], []>} : vector<8x8xbf16>, vector<8x8xbf16>, vector<8x8xf32> -> vector<8x8xf32>
    %92 = tpu.concatenate %31, %51, %71, %91 in 1 : vector<8x8xf32>, vector<8x8xf32>, vector<8x8xf32>, vector<8x8xf32> -> vector<8x32xf32>
    %93 = arith.truncf %92 : vector<8x32xf32> to vector<8x32xbf16>
    %c0_28 = arith.constant 0 : index
    %c0_29 = arith.constant 0 : index
    %c0_30 = arith.constant 0 : index
    %94 = vector.load %arg7[%c0_28, %c0_29, %c0_30] : memref<1x32x32xbf16, #tpu.memory_space<vmem>>, vector<1x32x32xbf16>
    %95 = vector.shape_cast %94 : vector<1x32x32xbf16> to vector<32x32xbf16>
    %cst_31 = arith.constant dense<0.000000e+00> : vector<8x32xf32>
    %96 = tpu.matmul %93, %95, %cst_31 {dimension_numbers = #tpu.dot_dimension_numbers<[1], [0], [0], [1], [0, 0, 1, 1], [], []>} : vector<8x32xbf16>, vector<32x32xbf16>, vector<8x32xf32> -> vector<8x32xf32>
    %c0_32 = arith.constant 0 : index
    %c0_33 = arith.constant 0 : index
    %c0_34 = arith.constant 0 : index
    %97 = vector.load %arg8[%c0_32, %c0_33, %c0_34] : memref<1x1x32xf32, #tpu.memory_space<vmem>>, vector<1x1x32xf32>
    %98 = vector.shape_cast %97 : vector<1x1x32xf32> to vector<1x32xf32>
    %99 = vector.broadcast %98 : vector<1x32xf32> to vector<8x32xf32>
    %100 = arith.addf %96, %99 : vector<8x32xf32>
    %101 = arith.addf %100, %3 : vector<8x32xf32>
    %c0_35 = arith.constant 0 : index
    %c0_36 = arith.constant 0 : index
    %c0_37 = arith.constant 0 : index
    %102 = vector.load %arg13[%c0_35, %c0_36, %c0_37] : memref<1x1x32xf32, #tpu.memory_space<vmem>>, vector<1x1x32xf32>
    %103 = vector.shape_cast %102 : vector<1x1x32xf32> to vector<1x32xf32>
    %c0_38 = arith.constant 0 : index
    %c0_39 = arith.constant 0 : index
    %c0_40 = arith.constant 0 : index
    %104 = vector.load %arg14[%c0_38, %c0_39, %c0_40] : memref<1x1x32xf32, #tpu.memory_space<vmem>>, vector<1x1x32xf32>
    %105 = vector.shape_cast %104 : vector<1x1x32xf32> to vector<1x32xf32>
    %cst_41 = arith.constant dense<0.000000e+00> : vector<8xf32>
    %106 = vector.multi_reduction <add>, %101, %cst_41 [1] : vector<8x32xf32> to vector<8xf32>
    %107 = vector.shape_cast %106 : vector<8xf32> to vector<8x1xf32>
    %cst_42 = arith.constant 3.200000e+01 : f32
    %108 = vector.broadcast %cst_42 : f32 to vector<8x1xf32>
    %109 = arith.divf %107, %108 : vector<8x1xf32>
    %110 = vector.broadcast %109 : vector<8x1xf32> to vector<8x32xf32>
    %111 = arith.subf %101, %110 : vector<8x32xf32>
    %112 = arith.mulf %111, %111 : vector<8x32xf32>
    %cst_43 = arith.constant dense<0.000000e+00> : vector<8xf32>
    %113 = vector.multi_reduction <add>, %112, %cst_43 [1] : vector<8x32xf32> to vector<8xf32>
    %114 = vector.shape_cast %113 : vector<8xf32> to vector<8x1xf32>
    %cst_44 = arith.constant 3.200000e+01 : f32
    %115 = vector.broadcast %cst_44 : f32 to vector<8x1xf32>
    %116 = arith.divf %114, %115 : vector<8x1xf32>
    %117 = vector.broadcast %109 : vector<8x1xf32> to vector<8x32xf32>
    %118 = arith.subf %101, %117 : vector<8x32xf32>
    %cst_45 = arith.constant 9.99999974E-6 : f32
    %119 = vector.broadcast %cst_45 : f32 to vector<8x1xf32>
    %120 = arith.addf %116, %119 : vector<8x1xf32>
    %121 = math.rsqrt %120 : vector<8x1xf32>
    %122 = vector.broadcast %121 : vector<8x1xf32> to vector<8x32xf32>
    %123 = arith.mulf %118, %122 : vector<8x32xf32>
    %124 = vector.broadcast %103 : vector<1x32xf32> to vector<8x32xf32>
    %125 = arith.mulf %123, %124 : vector<8x32xf32>
    %126 = vector.broadcast %105 : vector<1x32xf32> to vector<8x32xf32>
    %127 = arith.addf %125, %126 : vector<8x32xf32>
    %128 = arith.truncf %127 : vector<8x32xf32> to vector<8x32xbf16>
    %cst_46 = arith.constant 0.000000e+00 : f32
    %129 = vector.broadcast %cst_46 : f32 to vector<8x32xf32>
    %c0_47 = arith.constant 0 : index
    %c0_48 = arith.constant 0 : index
    %c0_49 = arith.constant 0 : index
    %130 = vector.load %arg9[%c0_47, %c0_48, %c0_49] : memref<1x32x2048xbf16, #tpu.memory_space<vmem>>, vector<1x32x512xbf16>
    %131 = vector.shape_cast %130 : vector<1x32x512xbf16> to vector<32x512xbf16>
    %cst_50 = arith.constant dense<0.000000e+00> : vector<8x512xf32>
    %132 = tpu.matmul %128, %131, %cst_50 {dimension_numbers = #tpu.dot_dimension_numbers<[1], [0], [0], [1], [0, 0, 1, 1], [], []>} : vector<8x32xbf16>, vector<32x512xbf16>, vector<8x512xf32> -> vector<8x512xf32>
    %c0_51 = arith.constant 0 : index
    %c0_52 = arith.constant 0 : index
    %c0_53 = arith.constant 0 : index
    %133 = vector.load %arg10[%c0_51, %c0_52, %c0_53] : memref<1x1x2048xf32, #tpu.memory_space<vmem>>, vector<1x1x512xf32>
    %134 = vector.shape_cast %133 : vector<1x1x512xf32> to vector<1x512xf32>
    %135 = vector.broadcast %134 : vector<1x512xf32> to vector<8x512xf32>
    %136 = arith.addf %132, %135 : vector<8x512xf32>
    %cst_54 = arith.constant 0.000000e+00 : f32
    %137 = vector.broadcast %cst_54 : f32 to vector<8x512xf32>
    %138 = arith.maximumf %136, %137 : vector<8x512xf32>
    %139 = arith.truncf %138 : vector<8x512xf32> to vector<8x512xbf16>
    %c0_55 = arith.constant 0 : index
    %c0_56 = arith.constant 0 : index
    %c0_57 = arith.constant 0 : index
    %140 = vector.load %arg11[%c0_55, %c0_56, %c0_57] : memref<1x2048x32xbf16, #tpu.memory_space<vmem>>, vector<1x512x32xbf16>
    %141 = vector.shape_cast %140 : vector<1x512x32xbf16> to vector<512x32xbf16>
    %cst_58 = arith.constant dense<0.000000e+00> : vector<8x32xf32>
    %142 = tpu.matmul %139, %141, %cst_58 {dimension_numbers = #tpu.dot_dimension_numbers<[1], [0], [0], [1], [0, 0, 1, 1], [], []>} : vector<8x512xbf16>, vector<512x32xbf16>, vector<8x32xf32> -> vector<8x32xf32>
    %143 = arith.addf %129, %142 : vector<8x32xf32>
    %c0_59 = arith.constant 0 : index
    %c0_60 = arith.constant 0 : index
    %c512 = arith.constant 512 : index
    %144 = vector.load %arg9[%c0_59, %c0_60, %c512] : memref<1x32x2048xbf16, #tpu.memory_space<vmem>>, vector<1x32x512xbf16>
    %145 = vector.shape_cast %144 : vector<1x32x512xbf16> to vector<32x512xbf16>
    %cst_61 = arith.constant dense<0.000000e+00> : vector<8x512xf32>
    %146 = tpu.matmul %128, %145, %cst_61 {dimension_numbers = #tpu.dot_dimension_numbers<[1], [0], [0], [1], [0, 0, 1, 1], [], []>} : vector<8x32xbf16>, vector<32x512xbf16>, vector<8x512xf32> -> vector<8x512xf32>
    %c0_62 = arith.constant 0 : index
    %c0_63 = arith.constant 0 : index
    %c512_64 = arith.constant 512 : index
    %147 = vector.load %arg10[%c0_62, %c0_63, %c512_64] : memref<1x1x2048xf32, #tpu.memory_space<vmem>>, vector<1x1x512xf32>
    %148 = vector.shape_cast %147 : vector<1x1x512xf32> to vector<1x512xf32>
    %149 = vector.broadcast %148 : vector<1x512xf32> to vector<8x512xf32>
    %150 = arith.addf %146, %149 : vector<8x512xf32>
    %cst_65 = arith.constant 0.000000e+00 : f32
    %151 = vector.broadcast %cst_65 : f32 to vector<8x512xf32>
    %152 = arith.maximumf %150, %151 : vector<8x512xf32>
    %153 = arith.truncf %152 : vector<8x512xf32> to vector<8x512xbf16>
    %c0_66 = arith.constant 0 : index
    %c512_67 = arith.constant 512 : index
    %c0_68 = arith.constant 0 : index
    %154 = vector.load %arg11[%c0_66, %c512_67, %c0_68] : memref<1x2048x32xbf16, #tpu.memory_space<vmem>>, vector<1x512x32xbf16>
    %155 = vector.shape_cast %154 : vector<1x512x32xbf16> to vector<512x32xbf16>
    %cst_69 = arith.constant dense<0.000000e+00> : vector<8x32xf32>
    %156 = tpu.matmul %153, %155, %cst_69 {dimension_numbers = #tpu.dot_dimension_numbers<[1], [0], [0], [1], [0, 0, 1, 1], [], []>} : vector<8x512xbf16>, vector<512x32xbf16>, vector<8x32xf32> -> vector<8x32xf32>
    %157 = arith.addf %143, %156 : vector<8x32xf32>
    %c0_70 = arith.constant 0 : index
    %c0_71 = arith.constant 0 : index
    %c1024 = arith.constant 1024 : index
    %158 = vector.load %arg9[%c0_70, %c0_71, %c1024] : memref<1x32x2048xbf16, #tpu.memory_space<vmem>>, vector<1x32x512xbf16>
    %159 = vector.shape_cast %158 : vector<1x32x512xbf16> to vector<32x512xbf16>
    %cst_72 = arith.constant dense<0.000000e+00> : vector<8x512xf32>
    %160 = tpu.matmul %128, %159, %cst_72 {dimension_numbers = #tpu.dot_dimension_numbers<[1], [0], [0], [1], [0, 0, 1, 1], [], []>} : vector<8x32xbf16>, vector<32x512xbf16>, vector<8x512xf32> -> vector<8x512xf32>
    %c0_73 = arith.constant 0 : index
    %c0_74 = arith.constant 0 : index
    %c1024_75 = arith.constant 1024 : index
    %161 = vector.load %arg10[%c0_73, %c0_74, %c1024_75] : memref<1x1x2048xf32, #tpu.memory_space<vmem>>, vector<1x1x512xf32>
    %162 = vector.shape_cast %161 : vector<1x1x512xf32> to vector<1x512xf32>
    %163 = vector.broadcast %162 : vector<1x512xf32> to vector<8x512xf32>
    %164 = arith.addf %160, %163 : vector<8x512xf32>
    %cst_76 = arith.constant 0.000000e+00 : f32
    %165 = vector.broadcast %cst_76 : f32 to vector<8x512xf32>
    %166 = arith.maximumf %164, %165 : vector<8x512xf32>
    %167 = arith.truncf %166 : vector<8x512xf32> to vector<8x512xbf16>
    %c0_77 = arith.constant 0 : index
    %c1024_78 = arith.constant 1024 : index
    %c0_79 = arith.constant 0 : index
    %168 = vector.load %arg11[%c0_77, %c1024_78, %c0_79] : memref<1x2048x32xbf16, #tpu.memory_space<vmem>>, vector<1x512x32xbf16>
    %169 = vector.shape_cast %168 : vector<1x512x32xbf16> to vector<512x32xbf16>
    %cst_80 = arith.constant dense<0.000000e+00> : vector<8x32xf32>
    %170 = tpu.matmul %167, %169, %cst_80 {dimension_numbers = #tpu.dot_dimension_numbers<[1], [0], [0], [1], [0, 0, 1, 1], [], []>} : vector<8x512xbf16>, vector<512x32xbf16>, vector<8x32xf32> -> vector<8x32xf32>
    %171 = arith.addf %157, %170 : vector<8x32xf32>
    %c0_81 = arith.constant 0 : index
    %c0_82 = arith.constant 0 : index
    %c1536 = arith.constant 1536 : index
    %172 = vector.load %arg9[%c0_81, %c0_82, %c1536] : memref<1x32x2048xbf16, #tpu.memory_space<vmem>>, vector<1x32x512xbf16>
    %173 = vector.shape_cast %172 : vector<1x32x512xbf16> to vector<32x512xbf16>
    %cst_83 = arith.constant dense<0.000000e+00> : vector<8x512xf32>
    %174 = tpu.matmul %128, %173, %cst_83 {dimension_numbers = #tpu.dot_dimension_numbers<[1], [0], [0], [1], [0, 0, 1, 1], [], []>} : vector<8x32xbf16>, vector<32x512xbf16>, vector<8x512xf32> -> vector<8x512xf32>
    %c0_84 = arith.constant 0 : index
    %c0_85 = arith.constant 0 : index
    %c1536_86 = arith.constant 1536 : index
    %175 = vector.load %arg10[%c0_84, %c0_85, %c1536_86] : memref<1x1x2048xf32, #tpu.memory_space<vmem>>, vector<1x1x512xf32>
    %176 = vector.shape_cast %175 : vector<1x1x512xf32> to vector<1x512xf32>
    %177 = vector.broadcast %176 : vector<1x512xf32> to vector<8x512xf32>
    %178 = arith.addf %174, %177 : vector<8x512xf32>
    %cst_87 = arith.constant 0.000000e+00 : f32
    %179 = vector.broadcast %cst_87 : f32 to vector<8x512xf32>
    %180 = arith.maximumf %178, %179 : vector<8x512xf32>
    %181 = arith.truncf %180 : vector<8x512xf32> to vector<8x512xbf16>
    %c0_88 = arith.constant 0 : index
    %c1536_89 = arith.constant 1536 : index
    %c0_90 = arith.constant 0 : index
    %182 = vector.load %arg11[%c0_88, %c1536_89, %c0_90] : memref<1x2048x32xbf16, #tpu.memory_space<vmem>>, vector<1x512x32xbf16>
    %183 = vector.shape_cast %182 : vector<1x512x32xbf16> to vector<512x32xbf16>
    %cst_91 = arith.constant dense<0.000000e+00> : vector<8x32xf32>
    %184 = tpu.matmul %181, %183, %cst_91 {dimension_numbers = #tpu.dot_dimension_numbers<[1], [0], [0], [1], [0, 0, 1, 1], [], []>} : vector<8x512xbf16>, vector<512x32xbf16>, vector<8x32xf32> -> vector<8x32xf32>
    %185 = arith.addf %171, %184 : vector<8x32xf32>
    %186 = arith.addf %127, %185 : vector<8x32xf32>
    %c0_92 = arith.constant 0 : index
    %c0_93 = arith.constant 0 : index
    %c0_94 = arith.constant 0 : index
    %187 = vector.load %arg12[%c0_92, %c0_93, %c0_94] : memref<1x1x32xf32, #tpu.memory_space<vmem>>, vector<1x1x32xf32>
    %188 = vector.shape_cast %187 : vector<1x1x32xf32> to vector<1x32xf32>
    %189 = vector.broadcast %188 : vector<1x32xf32> to vector<8x32xf32>
    %190 = arith.addf %186, %189 : vector<8x32xf32>
    %c0_95 = arith.constant 0 : index
    %c0_96 = arith.constant 0 : index
    %c0_97 = arith.constant 0 : index
    %191 = vector.load %arg15[%c0_95, %c0_96, %c0_97] : memref<1x1x32xf32, #tpu.memory_space<vmem>>, vector<1x1x32xf32>
    %192 = vector.shape_cast %191 : vector<1x1x32xf32> to vector<1x32xf32>
    %c0_98 = arith.constant 0 : index
    %c0_99 = arith.constant 0 : index
    %c0_100 = arith.constant 0 : index
    %193 = vector.load %arg16[%c0_98, %c0_99, %c0_100] : memref<1x1x32xf32, #tpu.memory_space<vmem>>, vector<1x1x32xf32>
    %194 = vector.shape_cast %193 : vector<1x1x32xf32> to vector<1x32xf32>
    %cst_101 = arith.constant dense<0.000000e+00> : vector<8xf32>
    %195 = vector.multi_reduction <add>, %190, %cst_101 [1] : vector<8x32xf32> to vector<8xf32>
    %196 = vector.shape_cast %195 : vector<8xf32> to vector<8x1xf32>
    %cst_102 = arith.constant 3.200000e+01 : f32
    %197 = vector.broadcast %cst_102 : f32 to vector<8x1xf32>
    %198 = arith.divf %196, %197 : vector<8x1xf32>
    %199 = vector.broadcast %198 : vector<8x1xf32> to vector<8x32xf32>
    %200 = arith.subf %190, %199 : vector<8x32xf32>
    %201 = arith.mulf %200, %200 : vector<8x32xf32>
    %cst_103 = arith.constant dense<0.000000e+00> : vector<8xf32>
    %202 = vector.multi_reduction <add>, %201, %cst_103 [1] : vector<8x32xf32> to vector<8xf32>
    %203 = vector.shape_cast %202 : vector<8xf32> to vector<8x1xf32>
    %cst_104 = arith.constant 3.200000e+01 : f32
    %204 = vector.broadcast %cst_104 : f32 to vector<8x1xf32>
    %205 = arith.divf %203, %204 : vector<8x1xf32>
    %206 = vector.broadcast %198 : vector<8x1xf32> to vector<8x32xf32>
    %207 = arith.subf %190, %206 : vector<8x32xf32>
    %cst_105 = arith.constant 9.99999974E-6 : f32
    %208 = vector.broadcast %cst_105 : f32 to vector<8x1xf32>
    %209 = arith.addf %205, %208 : vector<8x1xf32>
    %210 = math.rsqrt %209 : vector<8x1xf32>
    %211 = vector.broadcast %210 : vector<8x1xf32> to vector<8x32xf32>
    %212 = arith.mulf %207, %211 : vector<8x32xf32>
    %213 = vector.broadcast %192 : vector<1x32xf32> to vector<8x32xf32>
    %214 = arith.mulf %212, %213 : vector<8x32xf32>
    %215 = vector.broadcast %194 : vector<1x32xf32> to vector<8x32xf32>
    %216 = arith.addf %214, %215 : vector<8x32xf32>
    %c0_106 = arith.constant 0 : index
    %c0_107 = arith.constant 0 : index
    %217 = vector.load %arg20[%c0_106, %c0_107] : memref<8x32xf32, #tpu.memory_space<vmem>>, vector<8x32xf32>
    tpu.vector_store %arg20[%c0_106, %c0_107], %216 {strides = array<i32>} : memref<8x32xf32, #tpu.memory_space<vmem>>, vector<8x32xf32>,
    %c1_i32 = arith.constant 1 : i32
    %218 = arith.cmpi eq, %arg1, %c1_i32 : i32
    %219 = arith.extui %218 : i1 to i32
    %c0_i32_108 = arith.constant 0 : i32
    %220 = arith.cmpi ne, %219, %c0_i32_108 : i32
    scf.if %220 {
      %221 = arith.truncf %216 : vector<8x32xf32> to vector<8x32xbf16>
      %c0_109 = arith.constant 0 : index
      %c0_110 = arith.constant 0 : index
      %222 = vector.load %arg17[%c0_109, %c0_110] : memref<32x16xbf16, #tpu.memory_space<vmem>>, vector<32x16xbf16>
      %cst_111 = arith.constant dense<0.000000e+00> : vector<8x16xf32>
      %223 = tpu.matmul %221, %222, %cst_111 {dimension_numbers = #tpu.dot_dimension_numbers<[1], [0], [0], [1], [0, 0, 1, 1], [], []>} : vector<8x32xbf16>, vector<32x16xbf16>, vector<8x16xf32> -> vector<8x16xf32>
      %c0_112 = arith.constant 0 : index
      %c0_113 = arith.constant 0 : index
      %224 = vector.load %arg18[%c0_112, %c0_113] : memref<1x16xf32, #tpu.memory_space<vmem>>, vector<1x16xf32>
      %225 = vector.broadcast %224 : vector<1x16xf32> to vector<8x16xf32>
      %226 = arith.addf %223, %225 : vector<8x16xf32>
      %c0_114 = arith.constant 0 : index
      %c0_115 = arith.constant 0 : index
      %c0_116 = arith.constant 0 : index
      %227 = vector.load %arg19[%c0_114, %c0_115, %c0_116] : memref<1x8x16xf32, #tpu.memory_space<vmem>>, vector<1x8x16xf32>
      %228 = vector.shape_cast %227 : vector<1x8x16xf32> to vector<8x16xf32>
      %229 = vector.shape_cast %226 : vector<8x16xf32> to vector<1x8x16xf32>
      tpu.vector_store %arg19[%c0_114, %c0_115, %c0_116], %229 {strides = array<i32>} : memref<1x8x16xf32, #tpu.memory_space<vmem>>, vector<1x8x16xf32>,
    } else {
    }
    return
  }
  func.func @transform_0(%arg0: i32, %arg1: i32) -> (i32, i32, i32) {
    %c0_i32 = arith.constant 0 : i32
    %c0_i32_0 = arith.constant 0 : i32
    %c0_i32_1 = arith.constant 0 : i32
    return %arg0, %c0_i32, %c0_i32_0 : i32, i32, i32
  }
  func.func @transform_1(%arg0: i32, %arg1: i32) -> (i32, i32) {
    %c0_i32 = arith.constant 0 : i32
    %c0_i32_0 = arith.constant 0 : i32
    %c0_i32_1 = arith.constant 0 : i32
    return %c0_i32, %c0_i32_0 : i32, i32
  }
  func.func @transform_2(%arg0: i32, %arg1: i32) -> (i32, i32) {
    %c0_i32 = arith.constant 0 : i32
    %c0_i32_0 = arith.constant 0 : i32
    %c0_i32_1 = arith.constant 0 : i32
    return %c0_i32, %c0_i32_0 : i32, i32
  }
  func.func @transform_3(%arg0: i32, %arg1: i32) -> (i32, i32, i32) {
    %c0_i32 = arith.constant 0 : i32
    %c0_i32_0 = arith.constant 0 : i32
    %c0_i32_1 = arith.constant 0 : i32
    return %arg1, %c0_i32, %c0_i32_0 : i32, i32, i32
  }
  func.func @transform_4(%arg0: i32, %arg1: i32) -> (i32, i32, i32) {
    %c0_i32 = arith.constant 0 : i32
    %c0_i32_0 = arith.constant 0 : i32
    %c0_i32_1 = arith.constant 0 : i32
    return %arg1, %c0_i32, %c0_i32_0 : i32, i32, i32
  }
  func.func @transform_5(%arg0: i32, %arg1: i32) -> (i32, i32, i32) {
    %c0_i32 = arith.constant 0 : i32
    %c0_i32_0 = arith.constant 0 : i32
    %c0_i32_1 = arith.constant 0 : i32
    return %arg1, %c0_i32, %c0_i32_0 : i32, i32, i32
  }
  func.func @transform_6(%arg0: i32, %arg1: i32) -> (i32, i32, i32) {
    %c0_i32 = arith.constant 0 : i32
    %c0_i32_0 = arith.constant 0 : i32
    %c0_i32_1 = arith.constant 0 : i32
    return %arg1, %c0_i32, %c0_i32_0 : i32, i32, i32
  }
  func.func @transform_7(%arg0: i32, %arg1: i32) -> (i32, i32, i32) {
    %c0_i32 = arith.constant 0 : i32
    %c0_i32_0 = arith.constant 0 : i32
    %c0_i32_1 = arith.constant 0 : i32
    return %arg1, %c0_i32, %c0_i32_0 : i32, i32, i32
  }
  func.func @transform_8(%arg0: i32, %arg1: i32) -> (i32, i32, i32) {
    %c0_i32 = arith.constant 0 : i32
    %c0_i32_0 = arith.constant 0 : i32
    %c0_i32_1 = arith.constant 0 : i32
    return %arg1, %c0_i32, %c0_i32_0 : i32, i32, i32
  }
  func.func @transform_9(%arg0: i32, %arg1: i32) -> (i32, i32, i32) {
    %c0_i32 = arith.constant 0 : i32
    %c0_i32_0 = arith.constant 0 : i32
    %c0_i32_1 = arith.constant 0 : i32
    return %arg1, %c0_i32, %c0_i32_0 : i32, i32, i32
  }
  func.func @transform_10(%arg0: i32, %arg1: i32) -> (i32, i32, i32) {
    %c0_i32 = arith.constant 0 : i32
    %c0_i32_0 = arith.constant 0 : i32
    %c0_i32_1 = arith.constant 0 : i32
    return %arg1, %c0_i32, %c0_i32_0 : i32, i32, i32
  }
  func.func @transform_11(%arg0: i32, %arg1: i32) -> (i32, i32, i32) {
    %c0_i32 = arith.constant 0 : i32
    %c0_i32_0 = arith.constant 0 : i32
    %c0_i32_1 = arith.constant 0 : i32
    return %arg1, %c0_i32, %c0_i32_0 : i32, i32, i32
  }
  func.func @transform_12(%arg0: i32, %arg1: i32) -> (i32, i32, i32) {
    %c0_i32 = arith.constant 0 : i32
    %c0_i32_0 = arith.constant 0 : i32
    %c0_i32_1 = arith.constant 0 : i32
    return %arg1, %c0_i32, %c0_i32_0 : i32, i32, i32
  }
  func.func @transform_13(%arg0: i32, %arg1: i32) -> (i32, i32, i32) {
    %c0_i32 = arith.constant 0 : i32
    %c0_i32_0 = arith.constant 0 : i32
    %c0_i32_1 = arith.constant 0 : i32
    return %arg1, %c0_i32, %c0_i32_0 : i32, i32, i32
  }
  func.func @transform_14(%arg0: i32, %arg1: i32) -> (i32, i32, i32) {
    %c0_i32 = arith.constant 0 : i32
    %c0_i32_0 = arith.constant 0 : i32
    %c0_i32_1 = arith.constant 0 : i32
    return %arg1, %c0_i32, %c0_i32_0 : i32, i32, i32
  }
  func.func @transform_15(%arg0: i32, %arg1: i32) -> (i32, i32) {
    %c0_i32 = arith.constant 0 : i32
    %c0_i32_0 = arith.constant 0 : i32
    %c0_i32_1 = arith.constant 0 : i32
    return %c0_i32, %c0_i32_0 : i32, i32
  }
  func.func @transform_16(%arg0: i32, %arg1: i32) -> (i32, i32) {
    %c0_i32 = arith.constant 0 : i32
    %c0_i32_0 = arith.constant 0 : i32
    %c0_i32_1 = arith.constant 0 : i32
    return %c0_i32, %c0_i32_0 : i32, i32
  }
  func.func @transform_17(%arg0: i32, %arg1: i32) -> (i32, i32, i32) {
    %c0_i32 = arith.constant 0 : i32
    %c0_i32_0 = arith.constant 0 : i32
    %c0_i32_1 = arith.constant 0 : i32
    return %arg0, %c0_i32, %c0_i32_0 : i32, i32, i32
  }
}

</mosaic_0001>

<bundles_post_ra>
// kernel: tpu_custom_call.1
= control target key start
LH: loop header
LB: loop body
LE: loop exit
PB: predicated region body
PF: predicated region fallthrough
CT: control target
= control target key end

     0   :  { %s5304_s0 = inlined_call_operand.vmem [shape: f32[2,8,16], index: 0, kind: input, shape index: {}]   ;;  %s5305_s1 = inlined_call_operand.vmem [shape: bf16[16,32], index: 1, kind: input, shape index: {}]   ;;  %s5306_s2 = inlined_call_operand.vmem [shape: f32[1,32], index: 2, kind: input, shape index: {}]   ;;  %s5307_s3 = inlined_call_operand.vmem [shape: bf16[2,32,96], index: 3, kind: input, shape index: {}]   ;;  %s5308_s4 = inlined_call_operand.vmem [shape: f32[2,1,96], index: 4, kind: input, shape index: {}]   ;;  %s5309_s5 = inlined_call_operand.vmem [shape: bf16[2,32,32], index: 5, kind: input, shape index: {}]   ;;  %s5310_s6 = inlined_call_operand.vmem [shape: f32[2,1,32], index: 6, kind: input, shape index: {}]   ;;  %s5311_s7 = inlined_call_operand.vmem [shape: bf16[2,32,2048], index: 7, kind: input, shape index: {}]   ;;  %s5312_s8 = inlined_call_operand.vmem [shape: f32[2,1,2048], index: 8, kind: input, shape index: {}]   ;;  %s5313_s9 = inlined_call_operand.vmem [shape: bf16[2,2048,32], index: 9, kind: input, shape index: {}]   ;;  %s5314_s10 = inlined_call_operand.vmem [shape: f32[2,1,32], index: 10, kind: input, shape index: {}]   ;;  %s5315_s11 = inlined_call_operand.vmem [shape: f32[2,1,32], index: 11, kind: input, shape index: {}]   ;;  %s5316_s12 = inlined_call_operand.vmem [shape: f32[2,1,32], index: 12, kind: input, shape index: {}]   ;;  %s5317_s13 = inlined_call_operand.vmem [shape: f32[2,1,32], index: 13, kind: input, shape index: {}]   ;;  %s5318_s14 = inlined_call_operand.vmem [shape: f32[2,1,32], index: 14, kind: input, shape index: {}]   ;;  %s5319_s15 = inlined_call_operand.vmem [shape: bf16[32,16], index: 15, kind: input, shape index: {}]   ;;  %s5320_s16 = inlined_call_operand.vmem [shape: f32[1,16], index: 16, kind: input, shape index: {}]   ;;  %s5321_s17 = inlined_call_operand.hbm [shape: f32[2,8,16], index: 17, kind: output, shape index: {}]  }
   0x1   :  { %5338 = sst [smem:[#allocation19_spill]] %s5304_s0 }
   0x2   :  { %5339 = sst [smem:[#allocation20_spill]] %s5305_s1 }
   0x3   :  { %5340 = sst [smem:[#allocation21_spill]] %s5306_s2 }
   0x4   :  { %5341 = sst [smem:[#allocation22_spill]] %s5307_s3 }
   0x5   :  { %5342 = sst [smem:[#allocation23_spill]] %s5309_s5 }
   0x6   :  { %5343 = sst [smem:[#allocation24_spill]] %s5310_s6 }
   0x7   :  { %5344 = sst [smem:[#allocation25_spill]] %s5311_s7 }
   0x8   :  { %5345 = sst [smem:[#allocation26_spill]] %s5312_s8 }
   0x9   :  { %5346 = sst [smem:[#allocation27_spill]] %s5313_s9 }
   0xa   :  { %5347 = sst [smem:[#allocation28_spill]] %s5319_s15 }
   0xb   :  { %5348 = sst [smem:[#allocation29_spill]] %s5320_s16 }
   0xc   :  { %5349 = sst [smem:[#allocation30_spill]] %s5321_s17 }
   0xd   :  { %22 = vsyncpa [#allocation4], 0 }
   0xe   :  { %24 = vsyncpa [#allocation4 + $0x1], 0  ;;  %s4715_s24 = smov 0   ;;  %s4717_s25 = smov 0  }
   0xf   :  { %s4719_s26 = smov 0   ;;  %s4721_s27 = smov 0  }
  0x10   :  { %s4723_s28 = smov 0   ;;  %s4725_s29 = smov 0  }
  0x11   :  { %s4727_s0 = smov 0   ;;  %s4729_s30 = smov 0  }
  0x12 LB: > { %5350 = sst [smem:[#allocation6_spill]] %s4573_s24  ;;  %s3757_s18 = sadd.s32 4294967295, %s4601_s30   ;;  %s4601_s30 = sphi %s4729_s30, %s30_s30   ;;  %s4597_s0 = sphi %s4727_s0, %s5395_s0   ;;  %s4593_s29 = sphi %s4725_s29, %s5394_s29   ;;  %s4589_s28 = sphi %s4723_s28, %s5393_s28   ;;  %s4585_s27 = sphi %s4721_s27, %s5392_s27   ;;  %s4581_s26 = sphi %s4719_s26, %s5391_s26   ;;  %s4577_s25 = sphi %s4717_s25, %s5390_s25   ;;  %s4573_s24 = sphi %s4715_s24, %s5389_s24  }
  0x13   : > { %5351 = sst [smem:[#allocation7_spill]] %s4577_s25  ;;  %s3758_s19 = sadd.s32 4294967294, %s4601_s30  }
  0x14   : > { %5352 = sst [smem:[#allocation8_spill]] %s4581_s26  ;;  %s39_s1 = sadd.s32 1, %s4593_s29 }
  0x15   : > { %5353 = sst [smem:[#allocation9_spill]] %s4585_s27  ;;  %p40_p0 = scmp.ge.s32.totalorder %s39_s1, 2 }
  0x16   : > { %5354 = sst [smem:[#allocation10_spill]] %s4589_s28  ;;  %s42_s20 = sadd.s32 1, %s4597_s0 }
  0x17   : > { %5355 = sst [smem:[#allocation11_spill]] %s4593_s29  ;;  %p481_p1 = scmp.ne.s32.totalorder %s4581_s26, %s4577_s25 }
  0x18   : > { %5356 = sst [smem:[#allocation12_spill]] %s4597_s0  ;;  %p482_p2 = scmp.eq.s32.totalorder %s3757_s18, 3 }
  0x19   : > { %5357 = sst [smem:[#allocation13_spill]] %s4601_s30  ;;  %s5397_s1 = smov (%p40_p0, %s39_s1), 0 }
  0x1a   : > { %5358 = sst [smem:[#allocation14_spill]] %s5397_s1  ;;  %s5399_s20 = smov (!%p40_p0, %s42_s20), %s4597_s0 }
  0x1b   : > { %p4764_p3 = por %p482_p2, %p481_p1  ;;  %p487_p4 = scmp.ne.s32.totalorder %s4577_s25, %s4573_s24 }
  0x1c   : > { %p44_p5 = scmp.ge.s32.totalorder %s5399_s20, 2  ;;  %p488_p6 = scmp.eq.s32.totalorder %s3758_s19, 3 }
  0x1d   : > { %s5359_s21 = scalar_select %p4764_p3, 1, 0 }
  0x1e   : > { %p3761_p7 = scmp.ge.s32.totalorder %s4601_s30, 1  ;;  %p606_p8 = scmp.lt.s32.totalorder %s4601_s30, 5 }
  0x1f   : > { %5360 = sst [smem:[#allocation15_spill]] %s5359_s21  ;;  %s5401_s20 = smov (%p44_p5, %s5399_s20), 0 }
  0x20   : > { %5361 = sst [smem:[#allocation16_spill]] %s5401_s20  ;;  %p4774_p9 = por %p488_p6, %p487_p4 }
  0x21   : > { %p607_p10 = pnand %p3761_p7, %p606_p8  ;;  %s468_s23 = ssub.s32 %s4597_s0, %s5401_s20 }
  0x22   : > { %s5362_s22 = scalar_select %p4774_p9, 1, 0 }
  0x23   : > { %s471_s18 = sadd.s32 1, %s4581_s26  ;;  %p469_p11 = scmp.eq.s32.totalorder %s468_s23, 0 }
  0x24   : > { %5363 = sst [smem:[#allocation17_spill]] %s5362_s22  ;;  %610 = sbr.rel (%p607_p10) target bundleno = 3580 (0xdfc), region = 88 }
  0x25   : > { %s4782_s1 = scalar_select %p469_p11, %s4581_s26, %s471_s18  }
  0x26   : > { %s5327_s19 = sand.u32 (!%p607_p10), 1, %s4577_s25   ;;  %p702_p12 = scmp.lt.s32.totalorder (!%p607_p10), %s4589_s28, 1 }
  0x27   : > { %5364 = sst [smem:[#allocation18_spill]] %s4782_s1  ;;  %s4788_s29 = sshll.u32 (!%p607_p10), %s5327_s19, 3 }
  0x28   : > { %p706_p13 = scmp.lt.s32.totalorder (!%p607_p10), %s4585_s27, 1  ;;  %s5365_s0 = sld [smem:[#allocation19_spill]] (!%p607_p10) }
  0x29   : > { %s5366_s3 = sld [smem:[#allocation22_spill]] (!%p607_p10)  ;;  %s5367_s5 = sld [smem:[#allocation23_spill]] (!%p607_p10) }
  0x2a   : > { %s5369_s8 = sld [smem:[#allocation26_spill]] (!%p607_p10)  ;;  %s5370_s7 = sld [smem:[#allocation25_spill]] (!%p607_p10) }
  0x2b   : > { %s703_s22 = scalar_select %p702_p12, %s4589_s28, 1 }
  0x2c   : > { %s4793_s24 = scalar_select %p706_p13, %s4585_s27, 1 }
  0x2d   : > { %s3763_s23 = sshll.u32 %s703_s22, 3  ;;  %s5371_s9 = sld [smem:[#allocation27_spill]] }
  0x2e   : > { %s705_s19 = scalar_lea.vmem %s5365_s0, %s3763_s23  ;;  %s3975_s1 = sshll.u32 %s4793_s24, 4 }
  0x2f   : > { %s4802_s17 = scalar_lea.vmem %s5366_s3, %s3975_s1  ;;  %s4811_s22 = scalar_lea.vmem %s5367_s5, %s3975_s1 }
  0x30   : > { %s3977_s23 = sshll.u32 %s4793_s24, 8  ;;  %s4821_s26 = scalar_lea.vmem %s5369_s8, %s3975_s1 }
  0x31   : > { %s4826_s25 = scalar_lea.vmem %s5370_s7, %s3977_s23  ;;  %s3978_s21 = sshll.u32 %s4793_s24, 10 }
  0x32   : > { %s738_s20 = scalar_lea.vmem %s5314_s10, %s4793_s24  ;;  %s741_s27 = scalar_lea.vmem %s5315_s11, %s4793_s24 }
  0x33   : > { %s4832_s16 = scalar_lea.vmem %s5371_s9, %s3978_s21  ;;  %s744_s3 = scalar_lea.vmem %s5316_s12, %s4793_s24 }
  0x34   : > { %s747_s7 = scalar_lea.vmem %s5317_s13, %s4793_s24  ;;  %s750_s21 = scalar_lea.vmem %s5318_s14, %s4793_s24 }
  0x35   : > { %s701_s15 = scalar_lea.vmem [#allocation3], %s4788_s29  ;;  %s5372_s9 = sld [smem:[#allocation9_spill]] }
  0x3b   : > { %p3773_p0 = scmp.ne.s32.totalorder %s5372_s9, 0 }
  0x3c   : > { %s5373_s6 = sld [smem:[#allocation20_spill]] (!%p3773_p0)  ;;  %v4603_v1 = vmov (!%p3773_p0), 0.0   ;;  %v756_v2 = vld [vmem:[%s705_s19] sm:$0xff] (!%p3773_p0)  ;;  %vm4604_vm0 = vmmov (!%p3773_p0), 0   ;;  %vm773_vm1 = vcmask (!%p3773_p0), 130048   ;;  %s5374_s1 = sld [smem:[#allocation21_spill]] (!%p3773_p0) }
  0x3d   : > { %755 = sbr.rel (%p3773_p0) target bundleno = 285 (0x11d), region = 92  ;;  %4182 = vmatprep.subr.bf16.mxu0 (!%p3773_p0), %v4603_v1  ;;  %4184 = vmatprep.mubr.msk.bf16.mxu0 (!%p3773_p0), %vm4604_vm0, %v4603_v1  ;;  %v757_v3 = vpack.c.bf16 (!%p3773_p0), %v756_v2, %v756_v2  ;;  %vm817_vm2 = vcmask (!%p3773_p0), 261120  }
  0x42   : > { %v4352_v0 = vld [vmem:[%s5373_s6] sm:$0xff] (!%p3773_p0)  }
  0x43   : > { %4183 = vmatpush3.bf16.msra.mxu0 (!%p3773_p0), %v4352_v0  ;;  %v3774_v4 = vld [vmem:[%s5374_s1] ss:$0 sm:$0xff] (!%p3773_p0) }
  0x46   : > { %4185 = vmatmul.mubr.msk.bf16.vlgmr.msra.gmra.mrb[0].mxu0 %vm773_vm1, %v757_v3 }
 0x119   : > { %v811_v5 = vpop.f32.mrb[0].mxu0 }
 0x11a   : > { %v812_v6 = vadd.f32 %v3774_v4, %v811_v5  ;;  %v4186_v7 = vpop.f32.mrb[1].mxu0 }
 0x11b   : > { %v814_v8 = vpop.f32.mrb[2].mxu0 }
 0x11c   : > { %818 = vst.msk [vmem:[#allocation2] sm:$0xff] %vm817_vm2, %v812_v6  ;;  %v4187_v9 = vpop.f32.mrb[3].mxu0 }
 0x11d PF: > { %v4353_v10 = vld [vmem:[%s4802_s17] sm:$0xff]   ;;  %v4605_v11 = vmov 0.0   ;;  %v4354_v12 = vld [vmem:[%s4802_s17 + $0x8] sm:$0xff]   ;;  %vm4606_vm3 = vmmov 0   ;;  %vm844_vm4 = vcmask 261120   ;;  %s5375_s19 = scalar_lea.vmem %s5308_s4, %s4793_s24  ;;  %s4607_s18 = smov 120  }
 0x11e   : > { %4188 = vmatprep.subr.bf16.mxu0 %v4605_v11  ;;  %4196 = vmatprep.subr.bf16.mxu1 %v4605_v11  ;;  %v3777_v15 = vld [vmem:[%s5375_s19] ss:$0 sm:$0xff]  ;;  %s4608_s23 = smov 96   ;;  %s4609_s30 = smov 80   ;;  %vm892_vm5 = vcmask 64512   ;;  %vm957_vm6 = vcmask 1043456  }
 0x11f   : > { %4189 = vmatpush3.bf16.msra.mxu0 %v4353_v10  ;;  %4192 = vmatprep.mubr.msk.bf16.mxu0 %vm4606_vm3, %v4605_v11  ;;  %s4610_s28 = smov 88   ;;  %s4611_s5 = smov 72   ;;  %vm1347_vm7 = vcmask 130048   ;;  %vm1349_vm8 = vcmask 195584  }
 0x120   : > { %4190 = vmatprep.subr.bf16.mxu0 %v4605_v11  ;;  %4198 = vmatprep.mubr.msk.bf16.mxu1 %vm4606_vm3, %v4605_v11  ;;  %s4612_s2 = smov 112   ;;  %s4613_s6 = smov 104  }
 0x121   : > { %s4614_s0 = smov 56   ;;  %s4615_s8 = smov 64  }
 0x122   : > { %s4616_s1 = smov 40   ;;  %s4617_s9 = smov 48  }
 0x123   : > { %v4868_v13 = vld [vmem:[#allocation2] sm:$0xff]  ;;  %4191 = vmatpush3.bf16.msra.mxu0 %v4354_v12  ;;  %s4618_s17 = smov 8   ;;  %s4619_s19 = smov 16  }
 0x124   : > { %v820_v14 = vpack.c.bf16 %v4868_v13, %v4868_v13  ;;  %4202 = vmatprep.subr.bf16.mxu0 %v4605_v11 }
 0x126   : > { %4193 = vmatmul.mubr.msk.bf16.vlgmr.msra.gmra.mrb[0].mxu0 %vm844_vm4, %v820_v14 }
 0x127   : > { %4204 = vmatprep.mubr.msk.bf16.mxu0 %vm4606_vm3, %v4605_v11 }
 0x1f9   : > { %v882_v16 = vpop.f32.mrb[0].mxu0 }
 0x1fa   : > { %v883_v17 = vadd.f32 %v3777_v15, %v882_v16  ;;  %v4194_v18 = vpop.f32.mrb[1].mxu0 }
 0x1fb   : > { %v885_v19 = vpop.f32.mrb[2].mxu0 }
 0x1fc   : > { %v4884_v20 = vpack.c.bf16 %v883_v17, %v883_v17  ;;  %v4195_v21 = vpop.f32.mrb[3].mxu0 }
 0x1fe   : > { %1001 = vrot.lane.b32.xlu1 %v4884_v20, %s4607_s18  ;;  %890 = vrot.lane.b32.xlu0 %v4884_v20, %s4608_s23  ;;  %s4620_s18 = smov 24  }
 0x202   : > { %1114 = vrot.lane.b32.xlu1 %v4884_v20, %s4609_s30  ;;  %1003 = vrot.lane.b32.xlu0 %v4884_v20, %s4610_s28  ;;  %s5376_s30 = sld [smem:[#allocation24_spill]] }
 0x206   : > { %1225 = vrot.lane.b32.xlu1 %v4884_v20, %s4611_s5  ;;  %1112 = vrot.lane.b32.xlu0 %v4884_v20, %s4612_s2 }
 0x208   : > { %s5377_s28 = scalar_lea.vmem %s5376_s30, %s4793_s24 }
 0x20a   : > { %1223 = vrot.lane.b32.xlu0 %v4884_v20, %s4613_s6 }
 0x270   : > { %v891_v22 = vpop.permute.xlu0 %890  ;;  %v1002_v25 = vpop.permute.xlu1 %1001 }
 0x271   : > { %v897_v23 = vsel %vm892_vm5, %v891_v22, 0 }
 0x272   : > { %4197 = vmatpush3.bf16.xpose.msra.mxu1 %v897_v23 }
 0x273   : > { %4208 = vmatprep.subr.bf16.mxu1 %v4605_v11 }
 0x274   : > { %v1004_v24 = vpop.permute.xlu0 %1003  ;;  %v1115_v27 = vpop.permute.xlu1 %1114 }
 0x275   : > { %v1009_v26 = vsel %vm892_vm5, %v1004_v24, 0  ;;  %v1120_v28 = vsel %vm892_vm5, %v1115_v27, 0 }
 0x278   : > { %v1226_v29 = vpop.permute.xlu1 %1225  ;;  %v1113_v30 = vpop.permute.xlu0 %1112 }
 0x279   : > { %4199 = vmatmul.mubr.msk.bf16.vlgmr.msra.gmra.mrb[0].mxu1 %vm892_vm5, %v4884_v20  ;;  %v1231_v31 = vsel %vm892_vm5, %v1226_v29, 0 }
 0x27a   : > { %4209 = vmatpush3.bf16.xpose.msra.mxu1 %v1009_v26  ;;  %4210 = vmatprep.mubr.msk.bf16.mxu1 %vm4606_vm3, %v4605_v11 }
 0x27b   : > { %4220 = vmatprep.subr.bf16.mxu1 %v4605_v11 }
 0x27c   : > { %v1224_v32 = vpop.permute.xlu0 %1223 }
 0x281   : > { %4211 = vmatmul.mubr.msk.bf16.vlgmr.msra.gmra.mrb[4].mxu1 %vm892_vm5, %v1002_v25 }
 0x282   : > { %4221 = vmatpush3.bf16.xpose.msra.mxu1 %v1120_v28  ;;  %4222 = vmatprep.mubr.msk.bf16.mxu1 %vm4606_vm3, %v4605_v11 }
 0x283   : > { %4232 = vmatprep.subr.bf16.mxu1 %v4605_v11 }
 0x289   : > { %4223 = vmatmul.mubr.msk.bf16.vlgmr.msra.gmra.mrb[8].mxu1 %vm892_vm5, %v1113_v30 }
 0x28a   : > { %4233 = vmatpush3.bf16.xpose.msra.mxu1 %v1231_v31  ;;  %4234 = vmatprep.mubr.msk.bf16.mxu1 %vm4606_vm3, %v4605_v11 }
 0x28b   : > { %4244 = vmatprep.subr.bf16.mxu1 %v4605_v11 }
 0x291   : > { %4235 = vmatmul.mubr.msk.bf16.vlgmr.msra.gmra.mrb[12].mxu1 %vm892_vm5, %v1224_v32 }
 0x292   : > { %4248 = vmatprep.mubr.msk.bf16.mxu1 %vm4606_vm3, %v4605_v11 }
 0x34c   : > { %v933_v33 = vpop.f32.mrb[0].mxu1 }
 0x34d   : > { %v939_v34 = vmul.f32 0.35355338, %v933_v33  ;;  %v4200_v35 = vpop.f32.mrb[1].mxu1 }
 0x34e   : > { %v936_v36 = vpop.f32.mrb[2].mxu1 }
 0x34f   : > { %v4201_v37 = vpop.f32.mrb[3].mxu1  ;;  %v940_v38 = vsel %vm892_vm5, %v939_v34, -inf }
 0x350   : > { %941 = vmax.xlane.f32.xlu1 %v940_v38 }
 0x354   : > { %v1045_v39 = vpop.f32.mrb[4].mxu1 }
 0x355   : > { %v1051_v40 = vmul.f32 0.35355338, %v1045_v39  ;;  %v4212_v41 = vpop.f32.mrb[5].mxu1 }
 0x356   : > { %v1048_v42 = vpop.f32.mrb[6].mxu1 }
 0x357   : > { %v4213_v43 = vpop.f32.mrb[7].mxu1  ;;  %v1052_v44 = vsel %vm892_vm5, %v1051_v40, -inf }
 0x358   : > { %1053 = vmax.xlane.f32.xlu0 %v1052_v44 }
 0x35c   : > { %v1156_v45 = vpop.f32.mrb[8].mxu1 }
 0x35d   : > { %v1162_v46 = vmul.f32 0.35355338, %v1156_v45  ;;  %v4224_v47 = vpop.f32.mrb[9].mxu1 }
 0x35e   : > { %v1159_v48 = vpop.f32.mrb[10].mxu1  ;;  %v4355_v47 = vld [vmem:[%s4811_s22] sm:$0xff]  }
 0x35f   : > { %v4225_v49 = vpop.f32.mrb[11].mxu1  ;;  %v1163_v50 = vsel %vm892_vm5, %v1162_v46, -inf  ;;  %4245 = vmatpush3.bf16.msra.mxu1 %v4355_v47  ;;  %v4356_v48 = vld [vmem:[%s4811_s22 + $0x8] sm:$0xff]   ;;  %v1683_v47 = vld [vmem:[%s4826_s25 + $0xd0] sm:$0xff] }
 0x360   : > { %1164 = vmax.xlane.f32.xlu0 %v1163_v50  ;;  %4246 = vmatprep.subr.bf16.mxu1 %v4605_v11 }
 0x363   : > { %4247 = vmatpush3.bf16.msra.mxu1 %v4356_v48  ;;  %v1682_v48 = vld [vmem:[%s4826_s25 + $0x98] sm:$0xff] }
 0x364   : > { %v1267_v51 = vpop.f32.mrb[12].mxu1 }
 0x365   : > { %v1273_v52 = vmul.f32 0.35355338, %v1267_v51  ;;  %v4236_v53 = vpop.f32.mrb[13].mxu1 }
 0x366   : > { %v1270_v54 = vpop.f32.mrb[14].mxu1 }
 0x367   : > { %v4237_v55 = vpop.f32.mrb[15].mxu1  ;;  %v1274_v56 = vsel %vm892_vm5, %v1273_v52, -inf }
 0x368   : > { %1275 = vmax.xlane.f32.xlu1 %v1274_v56 }
 0x3dd   : > { %v942_v57 = vpop.xlane.xlu1 %941 }
 0x3de   : > { %v943_v58 = vsub.f32 %v939_v34, %v942_v57 }
 0x3e0   : > { %v944_v59 = vmul.f32 1.442695, %v943_v58 }
 0x3e2   : > { %4485 = vpow2.f32 %v944_v59 }
 0x3e5   : > { %v1054_v60 = vpop.xlane.xlu0 %1053 }
 0x3e6   : > { %v1055_v61 = vsub.f32 %v1051_v40, %v1054_v60 }
 0x3e8   : > { %v1056_v62 = vmul.f32 1.442695, %v1055_v61 }
 0x3ea   : > { %4487 = vpow2.f32 %v1056_v62 }
 0x3ec   : > { %v4486_v63 = vpop.eup %4485 }
 0x3ed   : > { %v1165_v0 = vpop.xlane.xlu0 %1164  ;;  %v946_v1 = vsel %vm892_vm5, %v4486_v63, 0.0 }
 0x3ee   : > { %v1166_v2 = vsub.f32 %v1162_v46, %v1165_v0  ;;  %947 = vadd.xlane.f32.xlu0 %v946_v1 }
 0x3f0   : > { %v1167_v3 = vmul.f32 1.442695, %v1166_v2 }
 0x3f2   : > { %4489 = vpow2.f32 %v1167_v3 }
 0x3f4   : > { %v4488_v4 = vpop.eup %4487 }
 0x3f5   : > { %v1058_v5 = vsel %vm892_vm5, %v4488_v4, 0.0  ;;  %v1276_v8 = vpop.xlane.xlu1 %1275 }
 0x3f6   : > { %1059 = vadd.xlane.f32.xlu1 %v1058_v5  ;;  %v1277_v9 = vsub.f32 %v1273_v52, %v1276_v8 }
 0x3f8   : > { %v1278_v10 = vmul.f32 1.442695, %v1277_v9 }
 0x3fa   : > { %4491 = vpow2.f32 %v1278_v10 }
 0x3fc   : > { %v4490_v6 = vpop.eup %4489 }
 0x3fd   : > { %v1169_v7 = vsel %vm892_vm5, %v4490_v6, 0.0 }
 0x3fe   : > { %1170 = vadd.xlane.f32.xlu0 %v1169_v7 }
 0x404   : > { %v4492_v12 = vpop.eup %4491 }
 0x405   : > { %v1280_v14 = vsel %vm892_vm5, %v4492_v12, 0.0 }
 0x407   : > { %1064 = vrot.lane.b32.xlu1 %v4884_v20, %s4614_s0 }
 0x414   : > { %952 = vrot.lane.b32.xlu0 %v4884_v20, %s4615_s8  ;;  %s5378_s8 = sld [smem:[#allocation9_spill]] }
 0x418   : > { %1286 = vrot.lane.b32.xlu0 %v4884_v20, %s4616_s1 }
 0x41a   : > { %p3966_p1 = scmp.ne.s32.totalorder %s5378_s8, 1 }
 0x41b   : > { %vm4623_vm9 = vmmov (!%p3966_p1), 0  }
 0x42b   : > { %1281 = vadd.xlane.f32.xlu1 %v1280_v14  ;;  %v1450_v14 = vld [vmem:[%s4826_s25] sm:$0xff] }
 0x43c   : > { %1175 = vrot.lane.b32.xlu1 %v4884_v20, %s4617_s9 }
 0x47b   : > { %v948_v15 = vpop.xlane.xlu0 %947 }
 0x47c   : > { %4493 = vrcp.f32 %v948_v15  ;;  %v1452_v15 = vld [vmem:[%s4826_s25 + $0x40] sm:$0xff] }
 0x483   : > { %v1060_v16 = vpop.xlane.xlu1 %1059 }
 0x484   : > { %4495 = vrcp.f32 %v1060_v16  ;;  %v1451_v16 = vld [vmem:[%s4826_s25 + $0x8] sm:$0xff] }
 0x486   : > { %v4494_v17 = vpop.eup %4493 }
 0x487   : > { %v950_v19 = vmul.f32 %v4494_v17, %v4486_v63  ;;  %v1065_v23 = vpop.permute.xlu1 %1064  ;;  %v3789_v63 = vld [vmem:[%s5377_s28] ss:$0 sm:$0xff]  ;;  %v3796_v17 = vcombine.high %v1450_v14, %v1452_v15 }
 0x488   : > { %v1070_v26 = vsel %vm957_vm6, %v1065_v23, 0  ;;  %v1456_v23 = vld [vmem:[%s4826_s25 + $0xc0] sm:$0xff] }
 0x489   : > { %v951_v24 = vpack.c.bf16 %v950_v19, %v950_v19 }
 0x48b   : > { %v1171_v18 = vpop.xlane.xlu0 %1170 }
 0x48c   : > { %4497 = vrcp.f32 %v1171_v18  ;;  %v1453_v18 = vld [vmem:[%s4826_s25 + $0x48] sm:$0xff] }
 0x48d   : > { %v3797_v19 = vcombine.low %v1451_v16, %v1453_v18 }
 0x48e   : > { %v4496_v25 = vpop.eup %4495 }
 0x48f   : > { %v953_v21 = vpop.permute.xlu0 %952  ;;  %v1062_v20 = vmul.f32 %v4496_v25, %v4488_v4 }
 0x490   : > { %v959_v22 = vsel %vm957_vm6, %v953_v21, 0  ;;  %v3798_v21 = vcombine.high %v1451_v16, %v1453_v18  ;;  %v4380_v16 = vld [vmem:[%s4832_s16 + $0x1a8] sm:$0xff]   ;;  %v4382_v18 = vld [vmem:[%s4832_s16 + $0x1f0] sm:$0xff]  }
 0x491   : > { %4203 = vmatpush3.bf16.msra.mxu0 %v959_v22  ;;  %v1063_v27 = vpack.c.bf16 %v1062_v20, %v1062_v20  ;;  %v1454_v22 = vld [vmem:[%s4826_s25 + $0x80] sm:$0xff] }
 0x492   : > { %4214 = vmatprep.subr.bf16.mxu0 %v4605_v11  ;;  %1564 = vmatprep.subr.bf16.mxu1 %v3798_v21  ;;  %v3800_v25 = vcombine.high %v1454_v22, %v1456_v23  ;;  %v3799_v20 = vcombine.low %v1454_v22, %v1456_v23  ;;  %v4385_v21 = vld [vmem:[%s4832_s16 + $0x178] sm:$0xff]  }
 0x493   : > { %v1287_v33 = vpop.permute.xlu0 %1286  ;;  %v4386_v22 = vld [vmem:[%s4832_s16 + $0x1f8] sm:$0xff]  }
 0x494   : > { %4205 = vmatmul.mubr.msk.bf16.vlgmr.msra.gmra.mrb[4].mxu0 %vm892_vm5, %v951_v24  ;;  %v1292_v35 = vsel %vm957_vm6, %v1287_v33, 0  ;;  %v1455_v24 = vld [vmem:[%s4826_s25 + $0x88] sm:$0xff]  ;;  %v1680_v33 = vld [vmem:[%s4826_s25 + $0x58] sm:$0xff] }
 0x495   : > { %4215 = vmatpush3.bf16.msra.mxu0 %v1070_v26  ;;  %4216 = vmatprep.mubr.msk.bf16.mxu0 %vm4606_vm3, %v4605_v11  ;;  %v1457_v26 = vld [vmem:[%s4826_s25 + $0xc8] sm:$0xff]  ;;  %v4387_v23 = vld [vmem:[%s4832_s16 + $0x138] sm:$0xff]  }
 0x496   : > { %4226 = vmatprep.subr.bf16.mxu0 %v4605_v11  ;;  %v4498_v28 = vpop.eup %4497 }
 0x497   : > { %v1173_v30 = vmul.f32 %v4498_v28, %v4490_v6  ;;  %v3802_v28 = vcombine.high %v1455_v24, %v1457_v26 }
 0x499   : > { %v1174_v34 = vpack.c.bf16 %v1173_v30, %v1173_v30  ;;  %v1679_v30 = vld [vmem:[%s4826_s25 + $0x50] sm:$0xff] }
 0x49c   : > { %4217 = vmatmul.mubr.msk.bf16.vlgmr.msra.gmra.mrb[8].mxu0 %vm892_vm5, %v1063_v27  ;;  %v3801_v27 = vcombine.low %v1455_v24, %v1457_v26  ;;  %v4388_v24 = vld [vmem:[%s4832_s16 + $0x1b8] sm:$0xff]   ;;  %v4390_v26 = vld [vmem:[%s4832_s16 + $0xc0] sm:$0xff]  }
 0x49d   : > { %4228 = vmatprep.mubr.msk.bf16.mxu0 %vm4606_vm3, %v4605_v11 }
 0x4b8   : > { %v1282_v29 = vpop.xlane.xlu1 %1281 }
 0x4b9   : > { %4499 = vrcp.f32 %v1282_v29  ;;  %v1677_v29 = vld [vmem:[%s4826_s25 + $0x10] sm:$0xff] }
 0x4bc   : > { %v1176_v31 = vpop.permute.xlu1 %1175 }
 0x4bd   : > { %v1181_v32 = vsel %vm957_vm6, %v1176_v31, 0  ;;  %v1678_v31 = vld [vmem:[%s4826_s25 + $0x18] sm:$0xff] }
 0x4be   : > { %4227 = vmatpush3.bf16.msra.mxu0 %v1181_v32  ;;  %v3806_v32 = vcombine.high %v1677_v29, %v1679_v30 }
 0x4bf   : > { %4238 = vmatprep.subr.bf16.mxu0 %v4605_v11 }
 0x4c1   : > { %4229 = vmatmul.mubr.msk.bf16.vlgmr.msra.gmra.mrb[12].mxu0 %vm892_vm5, %v1174_v34  ;;  %v4621_v34 = vmov 0  }
 0x4c2   : > { %4239 = vmatpush3.bf16.msra.mxu0 %v1292_v35  ;;  %4240 = vmatprep.mubr.msk.bf16.mxu0 %vm4606_vm3, %v4605_v11  ;;  %v3805_v35 = vcombine.low %v1677_v29, %v1679_v30 }
 0x4c3   : > { %v4500_v36 = vpop.eup %4499  ;;  %1523 = vmatprep.subr.bf16.mxu0 %v3796_v17  ;;  %v4381_v17 = vld [vmem:[%s4832_s16 + $0x170] sm:$0xff]  }
 0x4c4   : > { %v1284_v37 = vmul.f32 %v4500_v36, %v4492_v12  ;;  %v3807_v36 = vcombine.low %v1678_v31, %v1680_v33 }
 0x4c6   : > { %v1285_v38 = vpack.c.bf16 %v1284_v37, %v1284_v37  ;;  %v3808_v37 = vcombine.high %v1678_v31, %v1680_v33 }
 0x4c9   : > { %4241 = vmatmul.mubr.msk.bf16.vlgmr.msra.gmra.mrb[16].mxu0 %vm892_vm5, %v1285_v38 }
 0x4ca   : > { %1555 = vmatprep.mubr.bf16.mxu0 %v4621_v34 }
 0x567   : > { %v995_v39 = vpop.f32.mrb[4].mxu0 }
 0x568   : > { %v4206_v40 = vpop.f32.mrb[5].mxu0 }
 0x569   : > { %v998_v41 = vpop.f32.mrb[6].mxu0 }
 0x56a   : > { %v4207_v42 = vpop.f32.mrb[7].mxu0 }
 0x56b   : > { %v3793_v42 = vld [vmem:[%s741_s27] ss:$0 sm:$0xff] }
 0x56f   : > { %v1106_v43 = vpop.f32.mrb[8].mxu0 }
 0x570   : > { %1335 = vrot.lane.b32.xlu1 %v1106_v43, %s4618_s17  ;;  %v4218_v44 = vpop.f32.mrb[9].mxu0  ;;  %s5379_s17 = sld [smem:[#allocation28_spill]] (!%p3966_p1) }
 0x571   : > { %v1109_v45 = vpop.f32.mrb[10].mxu0  ;;  %v3794_v44 = vld [vmem:[%s744_s3] ss:$0 sm:$0xff] }
 0x572   : > { %v4219_v46 = vpop.f32.mrb[11].mxu0 }
 0x573   : > { %v1681_v46 = vld [vmem:[%s4826_s25 + $0x90] sm:$0xff] }
 0x594   : > { %v1217_v49 = vpop.f32.mrb[12].mxu0 }
 0x595   : > { %1339 = vrot.lane.b32.xlu0 %v1217_v49, %s4619_s19  ;;  %v4230_v50 = vpop.f32.mrb[13].mxu0  ;;  %v1684_v49 = vld [vmem:[%s4826_s25 + $0xd8] sm:$0xff] }
 0x596   : > { %v1220_v51 = vpop.f32.mrb[14].mxu0 }
 0x597   : > { %v4231_v52 = vpop.f32.mrb[15].mxu0 }
 0x598   : > { %v3810_v52 = vcombine.high %v1681_v46, %v1683_v47 }
 0x59c   : > { %v1328_v53 = vpop.f32.mrb[16].mxu0 }
 0x59d   : > { %1343 = vrot.lane.b32.xlu1 %v1328_v53, %s4620_s18  ;;  %v4242_v54 = vpop.f32.mrb[17].mxu0  ;;  %v3812_v53 = vcombine.high %v1682_v48, %v1684_v49  ;;  %s5380_s18 = sld [smem:[#allocation29_spill]] (!%p3966_p1) }
 0x59e   : > { %v1331_v55 = vpop.f32.mrb[18].mxu0  ;;  %v3809_v54 = vcombine.low %v1681_v46, %v1683_v47 }
 0x59f   : > { %v4243_v56 = vpop.f32.mrb[19].mxu0  ;;  %v3811_v55 = vcombine.low %v1682_v48, %v1684_v49 }
 0x5a0   : > { %v4357_v56 = vld [vmem:[%s4832_s16 + $0x140] sm:$0xff]  }
 0x5e2   : > { %v1336_v57 = vpop.permute.xlu1 %1335 }
 0x5e3   : > { %v1346_v11 = vsel %vm892_vm5, %v995_v39, %v1336_v57  ;;  %v4358_v57 = vld [vmem:[%s4832_s16 + $0x1c0] sm:$0xff]  }
 0x607   : > { %v1340_v58 = vpop.permute.xlu0 %1339 }
 0x608   : > { %v1348_v59 = vsel %vm1347_vm7, %v1346_v11, %v1340_v58  ;;  %v4359_v58 = vld [vmem:[%s4832_s16 + $0x100] sm:$0xff]  }
 0x609   : > { %v4360_v11 = vld [vmem:[%s4832_s16 + $0x180] sm:$0xff]  }
 0x60f   : > { %v1344_v60 = vpop.permute.xlu1 %1343 }
 0x610   : > { %v1350_v61 = vsel %vm1349_vm8, %v1348_v59, %v1344_v60  ;;  %v4361_v59 = vld [vmem:[%s4832_s16 + $0x148] sm:$0xff]  }
 0x611   : > { %v1351_v62 = vpack.c.bf16 %v1350_v61, %v1350_v61  ;;  %v4362_v60 = vld [vmem:[%s4832_s16 + $0x1c8] sm:$0xff]  }
 0x612   : > { %v4363_v61 = vld [vmem:[%s4832_s16 + $0x108] sm:$0xff]  }
 0x613   : > { %4249 = vmatmul.mubr.msk.bf16.vlgmr.msra.gmra.mrb[16].mxu1 %vm844_vm4, %v1351_v62  ;;  %v4364_v62 = vld [vmem:[%s4832_s16 + $0x188] sm:$0xff]  }
 0x614   : > { %1565 = vmatpush1.bf16.msra.mxu1 %v3797_v19  ;;  %1596 = vmatprep.mubr.bf16.mxu1 %v4621_v34  ;;  %v4384_v19 = vld [vmem:[%s4832_s16 + $0x1b0] sm:$0xff]  }
 0x615   : > { %1566 = vmatprep.subr.bf16.mxu1 %v3802_v28 }
 0x618   : > { %1567 = vmatpush1.bf16.msra.mxu1 %v3801_v27 }
 0x619   : > { %1788 = vmatprep.subr.bf16.mxu1 %v3808_v37 }
 0x6e6   : > { %v1412_v0 = vpop.f32.mrb[16].mxu1 }
 0x6e7   : > { %v1413_v1 = vadd.f32 %v3789_v63, %v1412_v0  ;;  %v4250_v2 = vpop.f32.mrb[17].mxu1  ;;  %v4365_v63 = vld [vmem:[%s4832_s16 + $0x150] sm:$0xff]  }
 0x6e8   : > { %v1415_v3 = vpop.f32.mrb[18].mxu1  ;;  %v4366_v0 = vld [vmem:[%s4832_s16 + $0x1d0] sm:$0xff]  }
 0x6e9   : > { %v4251_v4 = vpop.f32.mrb[19].mxu1  ;;  %v1418_v5 = vadd.f32 %v1413_v1, %v4868_v13  ;;  %v3795_v13 = vcombine.low %v1450_v14, %v1452_v15  ;;  %v4367_v1 = vld [vmem:[%s4832_s16 + $0x110] sm:$0xff]   ;;  %v4369_v3 = vld [vmem:[%s4832_s16 + $0x158] sm:$0xff]   ;;  %v4378_v14 = vld [vmem:[%s4832_s16 + $0x1e8] sm:$0xff]  }
 0x6ea   : > { %v4368_v2 = vld [vmem:[%s4832_s16 + $0x190] sm:$0xff]   ;;  %v4370_v4 = vld [vmem:[%s4832_s16 + $0x1d8] sm:$0xff]   ;;  %v4379_v15 = vld [vmem:[%s4832_s16 + $0x128] sm:$0xff]  }
 0x6eb   : > { %v1421_v6 = vsel %vm844_vm4, %v1418_v5, 0.0  ;;  %1524 = vmatpush1.bf16.msra.mxu0 %v3795_v13  ;;  %v4383_v13 = vld [vmem:[%s4832_s16 + $0x130] sm:$0xff]  }
 0x6ec   : > { %1422 = vadd.xlane.f32.xlu0 %v1421_v6  ;;  %1525 = vmatprep.subr.bf16.mxu0 %v3800_v25  ;;  %v4372_v6 = vld [vmem:[%s4832_s16 + $0x198] sm:$0xff]   ;;  %v4389_v25 = vld [vmem:[%s4832_s16 + $0x40] sm:$0xff]  }
 0x6ef   : > { %1526 = vmatpush1.bf16.msra.mxu0 %v3799_v20  ;;  %v1460_v20 = vlaneseq }
 0x6f0   : > { %1747 = vmatprep.subr.bf16.mxu0 %v3806_v32 }
 0x6f1   : > { %v1461_v27 = vshrl.u32 %v1460_v20, 7  ;;  %v4404_v20 = vld [vmem:[%s4832_s16 + $0x98] sm:$0xff]  }
 0x6f3   : > { %v5039_v30 = vsub.s32 1, %v1461_v27  ;;  %v5041_v32 = vsub.s32 3, %v1461_v27 }
 0x779   : > { %v1423_v7 = vpop.xlane.xlu0 %1422 }
 0x77a   : > { %v1425_v8 = vmul.f32 0.03125, %v1423_v7  ;;  %v4373_v7 = vld [vmem:[%s4832_s16 + $0x160] sm:$0xff]  }
 0x77c   : > { %v1426_v9 = vsub.f32 %v1418_v5, %v1425_v8  ;;  %v4371_v5 = vld [vmem:[%s4832_s16 + $0x118] sm:$0xff]   ;;  %v4374_v8 = vld [vmem:[%s4832_s16 + $0x1e0] sm:$0xff]  }
 0x77e   : > { %v1427_v10 = vmul.f32 %v1426_v9, %v1426_v9 }
 0x780   : > { %v1428_v12 = vsel %vm844_vm4, %v1427_v10, 0.0  ;;  %v4376_v10 = vld [vmem:[%s4832_s16 + $0x1a0] sm:$0xff]  }
 0x781   : > { %1429 = vadd.xlane.f32.xlu1 %v1428_v12  ;;  %v4377_v12 = vld [vmem:[%s4832_s16 + $0x168] sm:$0xff]  }
 0x80e   : > { %v1430_v38 = vpop.xlane.xlu1 %1429 }
 0x80f   : > { %v1431_v39 = vmul.f32 0.03125, %v1430_v38  ;;  %v1685_v38 = vld [vmem:[%s4821_s26 + $0x4] sm:$0xf] }
 0x810   : > { %v1694_v47 = vrot.slane %v1685_v38, %v5039_v30  ;;  %v1702_v48 = vrot.slane %v1685_v38, %v5041_v32 }
 0x811   : > { %v1432_v40 = vadd.f32 1e-05, %v1431_v39  ;;  %v5047_v39 = vsub.s32 0, %v1461_v27 }
 0x813   : > { %4501 = vrsqrt.f32 %v1432_v40  ;;  %v5049_v40 = vsub.s32 2, %v1461_v27  ;;  %v4405_v27 = vld [vmem:[%s4832_s16 + $0x60] sm:$0xff]  }
 0x815   : > { %v1698_v46 = vrot.slane %v1685_v38, %v5049_v40 }
 0x81d   : > { %v4502_v41 = vpop.eup %4501 }
 0x81e   : > { %v1434_v43 = vmul.f32 %v4502_v41, %v1426_v9  ;;  %v4375_v9 = vld [vmem:[%s4832_s16 + $0x120] sm:$0xff]  }
 0x820   : > { %v1441_v45 = vmul.f32 %v3793_v42, %v1434_v43 }
 0x822   : > { %v4985_v50 = vadd.f32 %v3794_v44, %v1441_v45  ;;  %v1690_v45 = vrot.slane %v1685_v38, %v5047_v39  ;;  %v4410_v38 = vld [vmem:[%s4832_s16 + $0xe8] sm:$0xff]  }
 0x824   : > { %v4989_v51 = vpack.c.bf16 %v4985_v50, %v4985_v50 }
 0x826   : > { %3803 = vmatmul.mubr.msk.bf16.vlgmr.msra.gmra.mrb[20].mxu0 %vm844_vm4, %v4989_v51  ;;  %3804 = vmatmul.mubr.msk.bf16.vlgmr.msra.gmra.mrb[20].mxu1 %vm844_vm4, %v4989_v51 }
 0x827   : > { %1748 = vmatpush1.bf16.msra.mxu0 %v3805_v35  ;;  %1789 = vmatpush1.bf16.msra.mxu1 %v3807_v36  ;;  %v5044_v35 = vld [vmem:[%s4821_s26] sm:$0xf] }
 0x828   : > { %1749 = vmatprep.subr.bf16.mxu0 %v3810_v52  ;;  %1790 = vmatprep.subr.bf16.mxu1 %v3812_v53  ;;  %v1467_v43 = vrot.slane %v5044_v35, %v5039_v30  ;;  %v1475_v44 = vrot.slane %v5044_v35, %v5041_v32 }
 0x829   : > { %1779 = vmatprep.mubr.bf16.mxu0 %v4621_v34  ;;  %1820 = vmatprep.mubr.bf16.mxu1 %v4621_v34 }
 0x82b   : > { %1750 = vmatpush1.bf16.msra.mxu0 %v3809_v54  ;;  %1791 = vmatpush1.bf16.msra.mxu1 %v3811_v55 }
 0x82c   : > { %4003 = vmatprep.subr.bf16.mxu0 %v4357_v56  ;;  %4025 = vmatprep.subr.bf16.mxu1 %v4358_v57 }
 0x82e   : > { %3813 = vmatmul.mubr.msk.bf16.vlgmr.msra.gmra.mrb[24].mxu0 %vm844_vm4, %v4989_v51  ;;  %3814 = vmatmul.mubr.msk.bf16.vlgmr.msra.gmra.mrb[24].mxu1 %vm844_vm4, %v4989_v51 }
 0x82f   : > { %4004 = vmatpush3.bf16.msra.mxu0 %v4359_v58  ;;  %4026 = vmatpush3.bf16.msra.mxu1 %v4360_v11 }
 0x830   : > { %4005 = vmatprep.subr.bf16.mxu0 %v4361_v59  ;;  %4027 = vmatprep.subr.bf16.mxu1 %v4362_v60 }
 0x833   : > { %4006 = vmatpush3.bf16.msra.mxu0 %v4363_v61  ;;  %4028 = vmatpush3.bf16.msra.mxu1 %v4364_v62 }
 0x834   : > { %4007 = vmatprep.subr.bf16.mxu0 %v4365_v63  ;;  %4029 = vmatprep.subr.bf16.mxu1 %v4366_v0 }
 0x837   : > { %4008 = vmatpush3.bf16.msra.mxu0 %v4367_v1  ;;  %4030 = vmatpush3.bf16.msra.mxu1 %v4368_v2 }
 0x838   : > { %4009 = vmatprep.subr.bf16.mxu0 %v4369_v3  ;;  %4031 = vmatprep.subr.bf16.mxu1 %v4370_v4 }
 0x83b   : > { %4010 = vmatpush3.bf16.msra.mxu0 %v4371_v5  ;;  %4032 = vmatpush3.bf16.msra.mxu1 %v4372_v6 }
 0x83c   : > { %4011 = vmatprep.subr.bf16.mxu0 %v4373_v7  ;;  %4033 = vmatprep.subr.bf16.mxu1 %v4374_v8  ;;  %v4391_v8 = vld [vmem:[%s4832_s16] sm:$0xff]  }
 0x83f   : > { %4012 = vmatpush3.bf16.msra.mxu0 %v4375_v9  ;;  %4034 = vmatpush3.bf16.msra.mxu1 %v4376_v10  ;;  %v4392_v9 = vld [vmem:[%s4832_s16 + $0x80] sm:$0xff]  }
 0x840   : > { %4013 = vmatprep.subr.bf16.mxu0 %v4377_v12  ;;  %4035 = vmatprep.subr.bf16.mxu1 %v4378_v14  ;;  %v4393_v14 = vld [vmem:[%s4832_s16 + $0x48] sm:$0xff]  }
 0x843   : > { %4014 = vmatpush3.bf16.msra.mxu0 %v4379_v15  ;;  %4036 = vmatpush3.bf16.msra.mxu1 %v4380_v16  ;;  %v4394_v15 = vld [vmem:[%s4832_s16 + $0xc8] sm:$0xff]  }
 0x844   : > { %4015 = vmatprep.subr.bf16.mxu0 %v4381_v17  ;;  %4037 = vmatprep.subr.bf16.mxu1 %v4382_v18  ;;  %v4395_v18 = vld [vmem:[%s4832_s16 + $0x8] sm:$0xff]  }
 0x847   : > { %4016 = vmatpush3.bf16.msra.mxu0 %v4383_v13  ;;  %4038 = vmatpush3.bf16.msra.mxu1 %v4384_v19  ;;  %v4396_v13 = vld [vmem:[%s4832_s16 + $0x88] sm:$0xff]   ;;  %v4397_v19 = vld [vmem:[%s4832_s16 + $0x50] sm:$0xff]  }
 0x848   : > { %4017 = vmatprep.subr.bf16.mxu0 %v4385_v21  ;;  %4039 = vmatprep.subr.bf16.mxu1 %v4386_v22  ;;  %v4398_v21 = vld [vmem:[%s4832_s16 + $0xd0] sm:$0xff]  }
 0x849   : > { %v4399_v22 = vld [vmem:[%s4832_s16 + $0x10] sm:$0xff]  }
 0x84b   : > { %4018 = vmatpush3.bf16.msra.mxu0 %v4387_v23  ;;  %4040 = vmatpush3.bf16.msra.mxu1 %v4388_v24  ;;  %v4400_v23 = vld [vmem:[%s4832_s16 + $0x90] sm:$0xff]   ;;  %v4401_v24 = vld [vmem:[%s4832_s16 + $0x58] sm:$0xff]  }
 0x84c   : > { %4047 = vmatprep.subr.bf16.mxu0 %v4389_v25  ;;  %4069 = vmatprep.subr.bf16.mxu1 %v4390_v26  ;;  %v4402_v25 = vld [vmem:[%s4832_s16 + $0xd8] sm:$0xff]  }
 0x84d   : > { %v4403_v26 = vld [vmem:[%s4832_s16 + $0x18] sm:$0xff]  }
 0x8f9   : > { %v5035_v28 = vpop.f32.mrb[20].mxu0  ;;  %v5037_v29 = vpop.f32.mrb[20].mxu1 }
 0x8fa   : > { %v1559_v31 = vpop.f32.mrb[21].mxu0  ;;  %v1600_v33 = vpop.f32.mrb[21].mxu1 }
 0x8fb   : > { %v1561_v36 = vpop.f32.mrb[22].mxu0  ;;  %v1602_v37 = vpop.f32.mrb[22].mxu1  ;;  %v1560_v53 = vadd.f32 %v1559_v31, %v1467_v43  ;;  %v1601_v54 = vadd.f32 %v1600_v33, %v1475_v44  ;;  %v4406_v31 = vld [vmem:[%s4832_s16 + $0xe0] sm:$0xff]   ;;  %v1463_v43 = vrot.slane %v5044_v35, %v5047_v39  ;;  %v1471_v44 = vrot.slane %v5044_v35, %v5049_v40  ;;  %v4417_v35 = vld [vmem:[%s4832_s16 + $0x78] sm:$0xff]  }
 0x8fc   : > { %v1562_v41 = vpop.f32.mrb[23].mxu0  ;;  %v1603_v42 = vpop.f32.mrb[23].mxu1  ;;  %v4407_v33 = vld [vmem:[%s4832_s16 + $0x20] sm:$0xff]   ;;  %v4409_v37 = vld [vmem:[%s4832_s16 + $0x68] sm:$0xff]  }
 0x8fd   : > { %v1606_v4 = vmax.f32 %v1560_v53, 0.0  ;;  %v1608_v5 = vmax.f32 %v1601_v54, 0.0  ;;  %v4408_v36 = vld [vmem:[%s4832_s16 + $0xa0] sm:$0xff]   ;;  %v4411_v41 = vld [vmem:[%s4832_s16 + $0x28] sm:$0xff]   ;;  %v4418_v53 = vld [vmem:[%s4832_s16 + $0xf8] sm:$0xff]  }
 0x8fe   : > { %v4412_v42 = vld [vmem:[%s4832_s16 + $0xa8] sm:$0xff]   ;;  %v2445_v54 = vld [vmem:[%s4826_s25 + $0x20] sm:$0xff] }
 0x8ff   : > { %v1610_v16 = vpack.c.bf16 %v1606_v4, %v1606_v4  ;;  %v1612_v17 = vpack.c.bf16 %v1608_v5, %v1608_v5 }
 0x901   : > { %v1781_v49 = vpop.f32.mrb[24].mxu0  ;;  %v1822_v52 = vpop.f32.mrb[24].mxu1 }
 0x902   : > { %v1782_v55 = vadd.f32 %v1781_v49, %v1690_v45  ;;  %v1823_v56 = vadd.f32 %v1822_v52, %v1698_v46  ;;  %v1783_v57 = vpop.f32.mrb[25].mxu0  ;;  %v1824_v58 = vpop.f32.mrb[25].mxu1  ;;  %v4413_v45 = vld [vmem:[%s4832_s16 + $0x70] sm:$0xff]   ;;  %v1558_v49 = vadd.f32 %v5035_v28, %v1463_v43  ;;  %v1599_v52 = vadd.f32 %v5037_v29, %v1471_v44 }
 0x903   : > { %v1784_v11 = vadd.f32 %v1783_v57, %v1694_v47  ;;  %v1825_v59 = vadd.f32 %v1824_v58, %v1702_v48  ;;  %v1785_v60 = vpop.f32.mrb[26].mxu0  ;;  %v1826_v61 = vpop.f32.mrb[26].mxu1  ;;  %v4414_v46 = vld [vmem:[%s4832_s16 + $0xf0] sm:$0xff]   ;;  %v2448_v57 = vld [vmem:[%s4826_s25 + $0x68] sm:$0xff]  ;;  %v4419_v58 = vld [vmem:[%s4832_s16 + $0x38] sm:$0xff]  }
 0x904   : > { %v1829_v62 = vmax.f32 %v1782_v55, 0.0  ;;  %v1831_v63 = vmax.f32 %v1823_v56, 0.0  ;;  %v1786_v0 = vpop.f32.mrb[27].mxu0  ;;  %v1827_v1 = vpop.f32.mrb[27].mxu1  ;;  %v4415_v47 = vld [vmem:[%s4832_s16 + $0x30] sm:$0xff]   ;;  %v2447_v55 = vld [vmem:[%s4826_s25 + $0x60] sm:$0xff] }
 0x905   : > { %v1830_v2 = vmax.f32 %v1784_v11, 0.0  ;;  %v1832_v3 = vmax.f32 %v1825_v59, 0.0  ;;  %v4416_v48 = vld [vmem:[%s4832_s16 + $0xb0] sm:$0xff]   ;;  %v2446_v56 = vld [vmem:[%s4826_s25 + $0x28] sm:$0xff]  ;;  %v4420_v11 = vld [vmem:[%s4832_s16 + $0xb8] sm:$0xff]   ;;  %v1605_v59 = vmax.f32 %v1558_v49, 0.0  ;;  %v3880_v29 = vcombine.high %v2445_v54, %v2447_v55 }
 0x906   : > { %v1833_v10 = vpack.c.bf16 %v1829_v62, %v1829_v62  ;;  %v1835_v12 = vpack.c.bf16 %v1831_v63, %v1831_v63  ;;  %v1607_v28 = vmax.f32 %v1599_v52, 0.0  ;;  %v3882_v60 = vcombine.high %v2446_v56, %v2448_v57  ;;  %v2449_v61 = vld [vmem:[%s4826_s25 + $0xa0] sm:$0xff]  ;;  %v2450_v63 = vld [vmem:[%s4826_s25 + $0xa8] sm:$0xff]  ;;  %v4446_v43 = vld [vmem:[%s4832_s16 + $0x2f0] sm:$0xff]  }
 0x907   : > { %v1834_v6 = vpack.c.bf16 %v1830_v2, %v1830_v2  ;;  %v1836_v7 = vpack.c.bf16 %v1832_v3, %v1832_v3  ;;  %v2451_v62 = vld [vmem:[%s4826_s25 + $0xe0] sm:$0xff]  ;;  %v2452_v0 = vld [vmem:[%s4826_s25 + $0xe8] sm:$0xff]  ;;  %v3879_v1 = vcombine.low %v2445_v54, %v2447_v55  ;;  %v3881_v2 = vcombine.low %v2446_v56, %v2448_v57  ;;  %v4447_v44 = vld [vmem:[%s4832_s16 + $0x230] sm:$0xff]  }
 0x908   : > { %v3884_v3 = vcombine.high %v2449_v61, %v2451_v62  ;;  %v1609_v4 = vpack.c.bf16 %v1605_v59, %v1605_v59  ;;  %v1611_v5 = vpack.c.bf16 %v1607_v28, %v1607_v28  ;;  %v4452_v49 = vld [vmem:[%s4832_s16 + $0x2b8] sm:$0xff]   ;;  %v5142_v52 = vld [vmem:[%s4826_s25 + $0x30] sm:$0xff] }
 0x909   : > { %2125 = vmatprep.mubr.bf16.mxu0 %v1834_v6  ;;  %2165 = vmatprep.mubr.bf16.mxu1 %v1836_v7  ;;  %v3886_v6 = vcombine.high %v2450_v63, %v2452_v0  ;;  %v3883_v7 = vcombine.low %v2449_v61, %v2451_v62  ;;  %v5153_v55 = vld [vmem:[%s4826_s25 + $0x78] sm:$0xff] }
 0x90a   : > { %2126 = vmatmul.mubr.bf16.vlgmr.msra.gmra.mrb[28].mxu0 %v1833_v10  ;;  %2166 = vmatmul.mubr.bf16.vlgmr.msra.gmra.mrb[28].mxu1 %v1835_v12  ;;  %v4422_v10 = vld [vmem:[%s4832_s16 + $0x2c0] sm:$0xff]  }
 0x90b   : > { %4048 = vmatpush3.bf16.msra.mxu0 %v4391_v8  ;;  %4070 = vmatpush3.bf16.msra.mxu1 %v4392_v9  ;;  %v3885_v8 = vcombine.low %v2450_v63, %v2452_v0  ;;  %v4421_v9 = vld [vmem:[%s4832_s16 + $0x240] sm:$0xff]  }
 0x90c   : > { %2397 = vmatprep.mubr.bf16.mxu0 %v1610_v16  ;;  %2437 = vmatprep.mubr.bf16.mxu1 %v1612_v17  ;;  %v4423_v12 = vld [vmem:[%s4832_s16 + $0x200] sm:$0xff]   ;;  %v4426_v16 = vld [vmem:[%s4832_s16 + $0x2c8] sm:$0xff]  }
 0x90d   : > { %4049 = vmatprep.subr.bf16.mxu0 %v4393_v14  ;;  %4071 = vmatprep.subr.bf16.mxu1 %v4394_v15  ;;  %v4424_v14 = vld [vmem:[%s4832_s16 + $0x280] sm:$0xff]   ;;  %v4425_v15 = vld [vmem:[%s4832_s16 + $0x248] sm:$0xff]  }
 0x90e   : > { %v4427_v17 = vld [vmem:[%s4832_s16 + $0x208] sm:$0xff]  }
 0x90f   : > { %4050 = vmatpush3.bf16.msra.mxu0 %v4395_v18  ;;  %4072 = vmatpush3.bf16.msra.mxu1 %v4396_v13  ;;  %v4428_v18 = vld [vmem:[%s4832_s16 + $0x288] sm:$0xff]   ;;  %v4429_v13 = vld [vmem:[%s4832_s16 + $0x250] sm:$0xff]  }
 0x910   : > { %4051 = vmatprep.subr.bf16.mxu0 %v4397_v19  ;;  %4073 = vmatprep.subr.bf16.mxu1 %v4398_v21  ;;  %v4430_v19 = vld [vmem:[%s4832_s16 + $0x2d0] sm:$0xff]  }
 0x911   : > { %v4431_v21 = vld [vmem:[%s4832_s16 + $0x210] sm:$0xff]  }
 0x913   : > { %4052 = vmatpush3.bf16.msra.mxu0 %v4399_v22  ;;  %4074 = vmatpush3.bf16.msra.mxu1 %v4400_v23  ;;  %v4432_v22 = vld [vmem:[%s4832_s16 + $0x290] sm:$0xff]   ;;  %v4433_v23 = vld [vmem:[%s4832_s16 + $0x258] sm:$0xff]  }
 0x914   : > { %4053 = vmatprep.subr.bf16.mxu0 %v4401_v24  ;;  %4075 = vmatprep.subr.bf16.mxu1 %v4402_v25  ;;  %v4434_v24 = vld [vmem:[%s4832_s16 + $0x2d8] sm:$0xff]  }
 0x915   : > { %v4435_v25 = vld [vmem:[%s4832_s16 + $0x218] sm:$0xff]  }
 0x917   : > { %4054 = vmatpush3.bf16.msra.mxu0 %v4403_v26  ;;  %4076 = vmatpush3.bf16.msra.mxu1 %v4404_v20  ;;  %v4436_v26 = vld [vmem:[%s4832_s16 + $0x298] sm:$0xff]   ;;  %v4437_v20 = vld [vmem:[%s4832_s16 + $0x260] sm:$0xff]  }
 0x918   : > { %4055 = vmatprep.subr.bf16.mxu0 %v4405_v27  ;;  %4077 = vmatprep.subr.bf16.mxu1 %v4406_v31  ;;  %v4438_v27 = vld [vmem:[%s4832_s16 + $0x2e0] sm:$0xff]  }
 0x919   : > { %v4439_v31 = vld [vmem:[%s4832_s16 + $0x220] sm:$0xff]  }
 0x91b   : > { %4056 = vmatpush3.bf16.msra.mxu0 %v4407_v33  ;;  %4078 = vmatpush3.bf16.msra.mxu1 %v4408_v36  ;;  %v4440_v33 = vld [vmem:[%s4832_s16 + $0x2a0] sm:$0xff]   ;;  %v4441_v36 = vld [vmem:[%s4832_s16 + $0x268] sm:$0xff]  }
 0x91c   : > { %4057 = vmatprep.subr.bf16.mxu0 %v4409_v37  ;;  %4079 = vmatprep.subr.bf16.mxu1 %v4410_v38  ;;  %v4442_v37 = vld [vmem:[%s4832_s16 + $0x2e8] sm:$0xff]  }
 0x91d   : > { %v4443_v38 = vld [vmem:[%s4832_s16 + $0x228] sm:$0xff]  }
 0x91f   : > { %4058 = vmatpush3.bf16.msra.mxu0 %v4411_v41  ;;  %4080 = vmatpush3.bf16.msra.mxu1 %v4412_v42  ;;  %v4444_v41 = vld [vmem:[%s4832_s16 + $0x2a8] sm:$0xff]   ;;  %v4445_v42 = vld [vmem:[%s4832_s16 + $0x270] sm:$0xff]  }
 0x920   : > { %4059 = vmatprep.subr.bf16.mxu0 %v4413_v45  ;;  %4081 = vmatprep.subr.bf16.mxu1 %v4414_v46  ;;  %v4448_v45 = vld [vmem:[%s4832_s16 + $0x2b0] sm:$0xff]   ;;  %v4449_v46 = vld [vmem:[%s4832_s16 + $0x278] sm:$0xff]  }
 0x923   : > { %4060 = vmatpush3.bf16.msra.mxu0 %v4415_v47  ;;  %4082 = vmatpush3.bf16.msra.mxu1 %v4416_v48  ;;  %v4450_v47 = vld [vmem:[%s4832_s16 + $0x2f8] sm:$0xff]  }
 0x924   : > { %4061 = vmatprep.subr.bf16.mxu0 %v4417_v35  ;;  %4083 = vmatprep.subr.bf16.mxu1 %v4418_v53  ;;  %v4451_v48 = vld [vmem:[%s4832_s16 + $0x238] sm:$0xff]   ;;  %v5145_v35 = vld [vmem:[%s4826_s25 + $0x70] sm:$0xff] }
 0x925   : > { %v5148_v53 = vld [vmem:[%s4826_s25 + $0x38] sm:$0xff]  ;;  %v3922_v54 = vcombine.high %v5142_v52, %v5145_v35  ;;  %v3921_v56 = vcombine.low %v5142_v52, %v5145_v35 }
 0x926   : > { %v3923_v57 = vcombine.low %v5148_v53, %v5153_v55 }
 0x927   : > { %4062 = vmatpush3.bf16.msra.mxu0 %v4419_v58  ;;  %4084 = vmatpush3.bf16.msra.mxu1 %v4420_v11  ;;  %v3924_v58 = vcombine.high %v5148_v53, %v5153_v55 }
 0x928   : > { %2515 = vmatprep.subr.bf16.mxu0 %v3880_v29  ;;  %2556 = vmatprep.subr.bf16.mxu1 %v3882_v60 }
 0x92a   : > { %2398 = vmatmul.mubr.bf16.vlgmr.msra.gmra.mrb[32].mxu0 %v1609_v4  ;;  %2438 = vmatmul.mubr.bf16.vlgmr.msra.gmra.mrb[32].mxu1 %v1611_v5 }
 0x92b   : > { %2516 = vmatpush1.bf16.msra.mxu0 %v3879_v1  ;;  %2557 = vmatpush1.bf16.msra.mxu1 %v3881_v2 }
 0x92c   : > { %2517 = vmatprep.subr.bf16.mxu0 %v3884_v3  ;;  %2558 = vmatprep.subr.bf16.mxu1 %v3886_v6 }
 0x92d   : > { %2547 = vmatprep.mubr.bf16.mxu0 %v4621_v34  ;;  %2588 = vmatprep.mubr.bf16.mxu1 %v4621_v34 }
 0x92f   : > { %2518 = vmatpush1.bf16.msra.mxu0 %v3883_v7  ;;  %2559 = vmatpush1.bf16.msra.mxu1 %v3885_v8 }
 0x930   : > { %4091 = vmatprep.subr.bf16.mxu0 %v4421_v9  ;;  %4113 = vmatprep.subr.bf16.mxu1 %v4422_v10 }
 0x932   : > { %3887 = vmatmul.mubr.msk.bf16.vlgmr.msra.gmra.mrb[36].mxu0 %vm844_vm4, %v4989_v51  ;;  %3888 = vmatmul.mubr.msk.bf16.vlgmr.msra.gmra.mrb[36].mxu1 %vm844_vm4, %v4989_v51 }
 0x933   : > { %4092 = vmatpush3.bf16.msra.mxu0 %v4423_v12  ;;  %4114 = vmatpush3.bf16.msra.mxu1 %v4424_v14  ;;  %v2453_v12 = vld [vmem:[%s4821_s26 + $0x8] sm:$0xf] }
 0x934   : > { %4093 = vmatprep.subr.bf16.mxu0 %v4425_v15  ;;  %4115 = vmatprep.subr.bf16.mxu1 %v4426_v16 }
 0x937   : > { %4094 = vmatpush3.bf16.msra.mxu0 %v4427_v17  ;;  %4116 = vmatpush3.bf16.msra.mxu1 %v4428_v18  ;;  %v2458_v17 = vrot.slane %v2453_v12, %v5047_v39  ;;  %v2466_v18 = vrot.slane %v2453_v12, %v5049_v40 }
 0x938   : > { %4095 = vmatprep.subr.bf16.mxu0 %v4429_v13  ;;  %4117 = vmatprep.subr.bf16.mxu1 %v4430_v19  ;;  %v2462_v19 = vrot.slane %v2453_v12, %v5039_v30 }
 0x93b   : > { %4096 = vmatpush3.bf16.msra.mxu0 %v4431_v21  ;;  %4118 = vmatpush3.bf16.msra.mxu1 %v4432_v22  ;;  %v2470_v21 = vrot.slane %v2453_v12, %v5041_v32  ;;  %v4475_v12 = vld [vmem:[%s4832_s16 + $0x328] sm:$0xff]  }
 0x93c   : > { %4097 = vmatprep.subr.bf16.mxu0 %v4433_v23  ;;  %4119 = vmatprep.subr.bf16.mxu1 %v4434_v24 }
 0x93f   : > { %4098 = vmatpush3.bf16.msra.mxu0 %v4435_v25  ;;  %4120 = vmatpush3.bf16.msra.mxu1 %v4436_v26 }
 0x940   : > { %4099 = vmatprep.subr.bf16.mxu0 %v4437_v20  ;;  %4121 = vmatprep.subr.bf16.mxu1 %v4438_v27 }
 0x943   : > { %4100 = vmatpush3.bf16.msra.mxu0 %v4439_v31  ;;  %4122 = vmatpush3.bf16.msra.mxu1 %v4440_v33 }
 0x944   : > { %4101 = vmatprep.subr.bf16.mxu0 %v4441_v36  ;;  %4123 = vmatprep.subr.bf16.mxu1 %v4442_v37 }
 0x947   : > { %4102 = vmatpush3.bf16.msra.mxu0 %v4443_v38  ;;  %4124 = vmatpush3.bf16.msra.mxu1 %v4444_v41 }
 0x948   : > { %4103 = vmatprep.subr.bf16.mxu0 %v4445_v42  ;;  %4125 = vmatprep.subr.bf16.mxu1 %v4446_v43  ;;  %v2946_v43 = vld [vmem:[%s4826_s25 + $0xb0] sm:$0xff] }
 0x94b   : > { %4104 = vmatpush3.bf16.msra.mxu0 %v4447_v44  ;;  %4126 = vmatpush3.bf16.msra.mxu1 %v4448_v45 }
 0x94c   : > { %4105 = vmatprep.subr.bf16.mxu0 %v4449_v46  ;;  %4127 = vmatprep.subr.bf16.mxu1 %v4450_v47  ;;  %v2948_v46 = vld [vmem:[%s4826_s25 + $0xf0] sm:$0xff]  ;;  %v2947_v47 = vld [vmem:[%s4826_s25 + $0xb8] sm:$0xff] }
 0x94f   : > { %4106 = vmatpush3.bf16.msra.mxu0 %v4451_v48  ;;  %4128 = vmatpush3.bf16.msra.mxu1 %v4452_v49  ;;  %v2949_v48 = vld [vmem:[%s4826_s25 + $0xf8] sm:$0xff] }
 0x950   : > { %3012 = vmatprep.subr.bf16.mxu0 %v3922_v54  ;;  %3053 = vmatprep.subr.bf16.mxu1 %v3924_v58  ;;  %v3926_v54 = vcombine.high %v2946_v43, %v2948_v46  ;;  %v3928_v55 = vcombine.high %v2947_v47, %v2949_v48  ;;  %v3925_v58 = vcombine.low %v2946_v43, %v2948_v46 }
 0x9dd   : > { %v4019_v11 = vpop.f32.mrb[28].mxu0  ;;  %v4041_v59 = vpop.f32.mrb[28].mxu1 }
 0x9de   : > { %v4020_v28 = vpop.f32.mrb[29].mxu0  ;;  %v4042_v29 = vpop.f32.mrb[29].mxu1 }
 0x9df   : > { %v4021_v60 = vadd.f32 %v4020_v28, %v4019_v11  ;;  %v4043_v61 = vadd.f32 %v4042_v29, %v4041_v59  ;;  %v4022_v62 = vpop.f32.mrb[30].mxu0  ;;  %v4044_v63 = vpop.f32.mrb[30].mxu1  ;;  %v3927_v11 = vcombine.low %v2947_v47, %v2949_v48  ;;  %v4453_v59 = vld [vmem:[%s4832_s16 + $0x340] sm:$0xff]  }
 0x9e0   : > { %v4023_v0 = vpop.f32.mrb[31].mxu0  ;;  %v4045_v1 = vpop.f32.mrb[31].mxu1  ;;  %v4454_v28 = vld [vmem:[%s4832_s16 + $0x3c0] sm:$0xff]   ;;  %v4461_v62 = vld [vmem:[%s4832_s16 + $0x350] sm:$0xff]  }
 0x9e1   : > { %v2168_v2 = vadd.f32 %v4043_v61, %v4021_v60  ;;  %v4456_v29 = vld [vmem:[%s4832_s16 + $0x380] sm:$0xff]   ;;  %v4458_v60 = vld [vmem:[%s4832_s16 + $0x3c8] sm:$0xff]   ;;  %v4462_v63 = vld [vmem:[%s4832_s16 + $0x3d0] sm:$0xff]  }
 0x9e2   : > { %v4460_v61 = vld [vmem:[%s4832_s16 + $0x388] sm:$0xff]   ;;  %v4463_v0 = vld [vmem:[%s4832_s16 + $0x310] sm:$0xff]  }
 0x9e3   : > { %v4464_v1 = vld [vmem:[%s4832_s16 + $0x390] sm:$0xff]  }
 0x9fd   : > { %v4063_v3 = vpop.f32.mrb[32].mxu0  ;;  %v4085_v4 = vpop.f32.mrb[32].mxu1 }
 0x9fe   : > { %v4064_v5 = vpop.f32.mrb[33].mxu0  ;;  %v4086_v6 = vpop.f32.mrb[33].mxu1 }
 0x9ff   : > { %v4065_v7 = vadd.f32 %v4064_v5, %v4063_v3  ;;  %v4087_v8 = vadd.f32 %v4086_v6, %v4085_v4  ;;  %v4066_v9 = vpop.f32.mrb[34].mxu0  ;;  %v4088_v10 = vpop.f32.mrb[34].mxu1  ;;  %v4467_v3 = vld [vmem:[%s4832_s16 + $0x318] sm:$0xff]   ;;  %v4469_v5 = vld [vmem:[%s4832_s16 + $0x360] sm:$0xff]  }
 0xa00   : > { %v4067_v14 = vpop.f32.mrb[35].mxu0  ;;  %v4089_v15 = vpop.f32.mrb[35].mxu1  ;;  %v4468_v4 = vld [vmem:[%s4832_s16 + $0x398] sm:$0xff]   ;;  %v4470_v6 = vld [vmem:[%s4832_s16 + $0x3e0] sm:$0xff]   ;;  %v4473_v9 = vld [vmem:[%s4832_s16 + $0x368] sm:$0xff]  }
 0xa01   : > { %v2400_v16 = vadd.f32 %v4065_v7, %v2168_v2  ;;  %v4466_v2 = vld [vmem:[%s4832_s16 + $0x3d8] sm:$0xff]   ;;  %v4471_v7 = vld [vmem:[%s4832_s16 + $0x320] sm:$0xff]   ;;  %v4474_v10 = vld [vmem:[%s4832_s16 + $0x3e8] sm:$0xff]  }
 0xa02   : > { %v4476_v14 = vld [vmem:[%s4832_s16 + $0x3a8] sm:$0xff]   ;;  %v4477_v15 = vld [vmem:[%s4832_s16 + $0x370] sm:$0xff]  }
 0xa03   : > { %v5164_v13 = vadd.f32 %v4087_v8, %v2400_v16  ;;  %v4472_v8 = vld [vmem:[%s4832_s16 + $0x3a0] sm:$0xff]   ;;  %v4478_v16 = vld [vmem:[%s4832_s16 + $0x3f0] sm:$0xff]  }
 0xa05   : > { %v2549_v22 = vpop.f32.mrb[36].mxu0  ;;  %v2590_v23 = vpop.f32.mrb[36].mxu1 }
 0xa06   : > { %v2550_v24 = vadd.f32 %v2549_v22, %v2458_v17  ;;  %v2591_v25 = vadd.f32 %v2590_v23, %v2466_v18  ;;  %v2551_v26 = vpop.f32.mrb[37].mxu0  ;;  %v2592_v20 = vpop.f32.mrb[37].mxu1  ;;  %v4479_v17 = vld [vmem:[%s4832_s16 + $0x330] sm:$0xff]   ;;  %v4483_v22 = vld [vmem:[%s4832_s16 + $0x338] sm:$0xff]  }
 0xa07   : > { %v2552_v27 = vadd.f32 %v2551_v26, %v2462_v19  ;;  %v2593_v31 = vadd.f32 %v2592_v20, %v2470_v21  ;;  %v2553_v33 = vpop.f32.mrb[38].mxu0  ;;  %v2594_v36 = vpop.f32.mrb[38].mxu1  ;;  %v4480_v18 = vld [vmem:[%s4832_s16 + $0x3b0] sm:$0xff]   ;;  %v4481_v19 = vld [vmem:[%s4832_s16 + $0x378] sm:$0xff]  }
 0xa08   : > { %v2597_v37 = vmax.f32 %v2550_v24, 0.0  ;;  %v2599_v38 = vmax.f32 %v2591_v25, 0.0  ;;  %v2554_v41 = vpop.f32.mrb[39].mxu0  ;;  %v2595_v42 = vpop.f32.mrb[39].mxu1  ;;  %v4482_v21 = vld [vmem:[%s4832_s16 + $0x3f8] sm:$0xff]  }
 0xa09   : > { %v2598_v44 = vmax.f32 %v2552_v27, 0.0  ;;  %v2600_v45 = vmax.f32 %v2593_v31, 0.0  ;;  %v4484_v23 = vld [vmem:[%s4832_s16 + $0x3b8] sm:$0xff]  }
 0xa0a   : > { %v2601_v35 = vpack.c.bf16 %v2597_v37, %v2597_v37  ;;  %v2603_v53 = vpack.c.bf16 %v2599_v38, %v2599_v38  ;;  %v2950_v37 = vld [vmem:[%s4821_s26 + $0xc] sm:$0xf] }
 0xa0b   : > { %v2602_v49 = vpack.c.bf16 %v2598_v44, %v2598_v44  ;;  %v2604_v52 = vpack.c.bf16 %v2600_v45, %v2600_v45  ;;  %v2955_v43 = vrot.slane %v2950_v37, %v5047_v39  ;;  %v2963_v44 = vrot.slane %v2950_v37, %v5049_v40 }
 0xa0c   : > { %v2959_v46 = vrot.slane %v2950_v37, %v5039_v30  ;;  %v2967_v47 = vrot.slane %v2950_v37, %v5041_v32 }
 0xa0d   : > { %2893 = vmatprep.mubr.bf16.mxu0 %v2602_v49  ;;  %2933 = vmatprep.mubr.bf16.mxu1 %v2604_v52 }
 0xa0e   : > { %2894 = vmatmul.mubr.bf16.vlgmr.msra.gmra.mrb[40].mxu0 %v2601_v35  ;;  %2934 = vmatmul.mubr.bf16.vlgmr.msra.gmra.mrb[40].mxu1 %v2603_v53 }
 0xa0f   : > { %3013 = vmatpush1.bf16.msra.mxu0 %v3921_v56  ;;  %3054 = vmatpush1.bf16.msra.mxu1 %v3923_v57  ;;  %v4455_v56 = vld [vmem:[%s4832_s16 + $0x300] sm:$0xff]   ;;  %v4457_v57 = vld [vmem:[%s4832_s16 + $0x348] sm:$0xff]  }
 0xa10   : > { %3014 = vmatprep.subr.bf16.mxu0 %v3926_v54  ;;  %3055 = vmatprep.subr.bf16.mxu1 %v3928_v55 }
 0xa11   : > { %3044 = vmatprep.mubr.bf16.mxu0 %v4621_v34  ;;  %3085 = vmatprep.mubr.bf16.mxu1 %v4621_v34  ;;  %v4459_v34 = vld [vmem:[%s4832_s16 + $0x308] sm:$0xff]  }
 0xa13   : > { %3015 = vmatpush1.bf16.msra.mxu0 %v3925_v58  ;;  %3056 = vmatpush1.bf16.msra.mxu1 %v3927_v11 }
 0xa14   : > { %4135 = vmatprep.subr.bf16.mxu0 %v4453_v59  ;;  %4157 = vmatprep.subr.bf16.mxu1 %v4454_v28 }
 0xa16   : > { %3929 = vmatmul.mubr.msk.bf16.vlgmr.msra.gmra.mrb[44].mxu0 %vm844_vm4, %v4989_v51  ;;  %3930 = vmatmul.mubr.msk.bf16.vlgmr.msra.gmra.mrb[44].mxu1 %vm844_vm4, %v4989_v51  ;;  %v4465_v51 = vld [vmem:[%s4832_s16 + $0x358] sm:$0xff]  }
 0xa17   : > { %4136 = vmatpush3.bf16.msra.mxu0 %v4455_v56  ;;  %4158 = vmatpush3.bf16.msra.mxu1 %v4456_v29 }
 0xa18   : > { %4137 = vmatprep.subr.bf16.mxu0 %v4457_v57  ;;  %4159 = vmatprep.subr.bf16.mxu1 %v4458_v60 }
 0xa1b   : > { %4138 = vmatpush3.bf16.msra.mxu0 %v4459_v34  ;;  %4160 = vmatpush3.bf16.msra.mxu1 %v4460_v61 }
 0xa1c   : > { %4139 = vmatprep.subr.bf16.mxu0 %v4461_v62  ;;  %4161 = vmatprep.subr.bf16.mxu1 %v4462_v63 }
 0xa1f   : > { %4140 = vmatpush3.bf16.msra.mxu0 %v4463_v0  ;;  %4162 = vmatpush3.bf16.msra.mxu1 %v4464_v1 }
 0xa20   : > { %4141 = vmatprep.subr.bf16.mxu0 %v4465_v51  ;;  %4163 = vmatprep.subr.bf16.mxu1 %v4466_v2 }
 0xa23   : > { %4142 = vmatpush3.bf16.msra.mxu0 %v4467_v3  ;;  %4164 = vmatpush3.bf16.msra.mxu1 %v4468_v4 }
 0xa24   : > { %4143 = vmatprep.subr.bf16.mxu0 %v4469_v5  ;;  %4165 = vmatprep.subr.bf16.mxu1 %v4470_v6 }
 0xa27   : > { %4144 = vmatpush3.bf16.msra.mxu0 %v4471_v7  ;;  %4166 = vmatpush3.bf16.msra.mxu1 %v4472_v8  ;;  %v3963_v7 = vld [vmem:[%s738_s20] ss:$0 sm:$0xff] }
 0xa28   : > { %4145 = vmatprep.subr.bf16.mxu0 %v4473_v9  ;;  %4167 = vmatprep.subr.bf16.mxu1 %v4474_v10 }
 0xa2b   : > { %4146 = vmatpush3.bf16.msra.mxu0 %v4475_v12  ;;  %4168 = vmatpush3.bf16.msra.mxu1 %v4476_v14 }
 0xa2c   : > { %4147 = vmatprep.subr.bf16.mxu0 %v4477_v15  ;;  %4169 = vmatprep.subr.bf16.mxu1 %v4478_v16 }
 0xa2f   : > { %4148 = vmatpush3.bf16.msra.mxu0 %v4479_v17  ;;  %4170 = vmatpush3.bf16.msra.mxu1 %v4480_v18 }
 0xa30   : > { %4149 = vmatprep.subr.bf16.mxu0 %v4481_v19  ;;  %4171 = vmatprep.subr.bf16.mxu1 %v4482_v21 }
 0xa33   : > { %4150 = vmatpush3.bf16.msra.mxu0 %v4483_v22  ;;  %4172 = vmatpush3.bf16.msra.mxu1 %v4484_v23 }
 0xae1   : > { %v4107_v24 = vpop.f32.mrb[40].mxu0  ;;  %v4129_v25 = vpop.f32.mrb[40].mxu1 }
 0xae2   : > { %v4108_v26 = vpop.f32.mrb[41].mxu0  ;;  %v4130_v20 = vpop.f32.mrb[41].mxu1 }
 0xae3   : > { %v4109_v27 = vadd.f32 %v4108_v26, %v4107_v24  ;;  %v4131_v31 = vadd.f32 %v4130_v20, %v4129_v25  ;;  %v4110_v33 = vpop.f32.mrb[42].mxu0  ;;  %v4132_v36 = vpop.f32.mrb[42].mxu1  ;;  %v3965_v24 = vld [vmem:[%s750_s21] ss:$0 sm:$0xff] }
 0xae4   : > { %v4111_v38 = vpop.f32.mrb[43].mxu0  ;;  %v4133_v41 = vpop.f32.mrb[43].mxu1  ;;  %v4505_v20 = vld [vmem:[%s5379_s17] sm:$0xff] (!%p3966_p1)  }
 0xae5   : > { %v2936_v42 = vadd.f32 %v4131_v31, %v4109_v27  ;;  %v4622_v27 = vmov (!%p3966_p1), 0.0   ;;  %v4506_v31 = vld [vmem:[%s5379_s17 + $0x8] sm:$0xff] (!%p3966_p1)   ;;  %v3967_v36 = vld [vmem:[%s5380_s18] ss:$0 sm:$0xff] (!%p3966_p1) }
 0xae6   : > { %4252 = vmatprep.subr.bf16.mxu0 (!%p3966_p1), %v4622_v27 }
 0xae7   : > { %v2941_v45 = vadd.f32 %v2936_v42, %v5164_v13 }
 0xae9   : > { %v3046_v48 = vpop.f32.mrb[44].mxu0  ;;  %v3087_v49 = vpop.f32.mrb[44].mxu1 }
 0xaea   : > { %v3047_v52 = vadd.f32 %v3046_v48, %v2955_v43  ;;  %v3088_v35 = vadd.f32 %v3087_v49, %v2963_v44  ;;  %v3048_v53 = vpop.f32.mrb[45].mxu0  ;;  %v3089_v54 = vpop.f32.mrb[45].mxu1 }
 0xaeb   : > { %v3049_v55 = vadd.f32 %v3048_v53, %v2959_v46  ;;  %v3090_v58 = vadd.f32 %v3089_v54, %v2967_v47  ;;  %v3050_v11 = vpop.f32.mrb[46].mxu0  ;;  %v3091_v59 = vpop.f32.mrb[46].mxu1 }
 0xaec   : > { %v3094_v28 = vmax.f32 %v3047_v52, 0.0  ;;  %v3096_v39 = vmax.f32 %v3088_v35, 0.0  ;;  %v3051_v56 = vpop.f32.mrb[47].mxu0  ;;  %v3092_v40 = vpop.f32.mrb[47].mxu1 }
 0xaed   : > { %v3095_v29 = vmax.f32 %v3049_v55, 0.0  ;;  %v3097_v13 = vmax.f32 %v3090_v58, 0.0 }
 0xaee   : > { %v3098_v60 = vpack.c.bf16 %v3094_v28, %v3094_v28  ;;  %v3100_v32 = vpack.c.bf16 %v3096_v39, %v3096_v39 }
 0xaef   : > { %v3099_v57 = vpack.c.bf16 %v3095_v29, %v3095_v29  ;;  %v3101_v30 = vpack.c.bf16 %v3097_v13, %v3097_v13 }
 0xaf1   : > { %3390 = vmatprep.mubr.bf16.mxu0 %v3099_v57  ;;  %3430 = vmatprep.mubr.bf16.mxu1 %v3101_v30 }
 0xaf2   : > { %3391 = vmatmul.mubr.bf16.vlgmr.msra.gmra.mrb[48].mxu0 %v3098_v60  ;;  %3431 = vmatmul.mubr.bf16.vlgmr.msra.gmra.mrb[48].mxu1 %v3100_v32 }
 0xaf3   : > { %4253 = vmatpush3.bf16.msra.mxu0 (!%p3966_p1), %v4505_v20  ;;  %4256 = vmatprep.mubr.msk.bf16.mxu0 (!%p3966_p1), %vm4623_vm9, %v4622_v27 }
 0xaf4   : > { %4254 = vmatprep.subr.bf16.mxu0 (!%p3966_p1), %v4622_v27 }
 0xaf7   : > { %4255 = vmatpush3.bf16.msra.mxu0 (!%p3966_p1), %v4506_v31 }
 0xbc5   : > { %v4151_v34 = vpop.f32.mrb[48].mxu0  ;;  %v4173_v61 = vpop.f32.mrb[48].mxu1 }
 0xbc6   : > { %v4152_v62 = vpop.f32.mrb[49].mxu0  ;;  %v4174_v63 = vpop.f32.mrb[49].mxu1 }
 0xbc7   : > { %v4153_v0 = vadd.f32 %v4152_v62, %v4151_v34  ;;  %v4175_v1 = vadd.f32 %v4174_v63, %v4173_v61  ;;  %v4154_v51 = vpop.f32.mrb[50].mxu0  ;;  %v4176_v2 = vpop.f32.mrb[50].mxu1 }
 0xbc8   : > { %v4155_v3 = vpop.f32.mrb[51].mxu0  ;;  %v4177_v4 = vpop.f32.mrb[51].mxu1 }
 0xbc9   : > { %v3433_v5 = vadd.f32 %v4175_v1, %v4153_v0 }
 0xbcb   : > { %v3438_v6 = vadd.f32 %v3433_v5, %v2941_v45 }
 0xbcd   : > { %v3439_v8 = vadd.f32 %v3438_v6, %v4985_v50  ;;  %v3964_v50 = vld [vmem:[%s747_s7] ss:$0 sm:$0xff] }
 0xbcf   : > { %v3447_v9 = vadd.f32 %v3963_v7, %v3439_v8 }
 0xbd1   : > { %v3450_v10 = vsel %vm844_vm4, %v3447_v9, 0.0 }
 0xbd2   : > { %3451 = vadd.xlane.f32.xlu0 %v3450_v10 }
 0xc5f   : > { %v3452_v12 = vpop.xlane.xlu0 %3451 }
 0xc60   : > { %v3453_v14 = vmul.f32 0.03125, %v3452_v12 }
 0xc62   : > { %v3454_v15 = vsub.f32 %v3447_v9, %v3453_v14 }
 0xc64   : > { %v3455_v16 = vmul.f32 %v3454_v15, %v3454_v15 }
 0xc66   : > { %v3456_v17 = vsel %vm844_vm4, %v3455_v16, 0.0 }
 0xc67   : > { %3457 = vadd.xlane.f32.xlu0 %v3456_v17 }
 0xcf4   : > { %v3458_v18 = vpop.xlane.xlu0 %3457 }
 0xcf5   : > { %v3459_v19 = vmul.f32 0.03125, %v3458_v18 }
 0xcf7   : > { %v3460_v21 = vadd.f32 1e-05, %v3459_v19 }
 0xcf9   : > { %4503 = vrsqrt.f32 %v3460_v21 }
 0xd03   : > { %v4504_v22 = vpop.eup %4503 }
 0xd04   : > { %v3462_v23 = vmul.f32 %v4504_v22, %v3454_v15  ;;  %3481 = sbr.rel (%p3966_p1) target bundleno = 3555 (0xde3), region = 96 }
 0xd06   : > { %v3469_v25 = vmul.f32 %v3964_v50, %v3462_v23 }
 0xd08   : > { %v3476_v26 = vadd.f32 %v3965_v24, %v3469_v25 }
 0xd0a   : > { %3477 = vst.msk [vmem:[#allocation2] sm:$0xff] %vm844_vm4, %v3476_v26  ;;  %v3482_v33 = vpack.c.bf16 (!%p3966_p1), %v3476_v26, %v3476_v26 }
 0xd0c   : > { %4257 = vmatmul.mubr.msk.bf16.vlgmr.msra.gmra.mrb[0].mxu0 %vm844_vm4, %v3482_v33 }
 0xddf   : > { %v3543_v37 = vpop.f32.mrb[0].mxu0 }
 0xde0   : > { %v3544_v38 = vadd.f32 %v3967_v36, %v3543_v37  ;;  %v4258_v41 = vpop.f32.mrb[1].mxu0 }
 0xde1   : > { %v3546_v42 = vpop.f32.mrb[2].mxu0 }
 0xde2   : > { %3549 = vst.msk [vmem:[%s701_s15] sm:$0xff] %vm1347_vm7, %v3544_v38  ;;  %v4259_v43 = vpop.f32.mrb[3].mxu0 }
 0xde3 PF: > { %s5381_s22 = sld [smem:[#allocation10_spill]]  ;;  %s5382_s23 = sld [smem:[#allocation7_spill]] }
 0xde4   : > { %s5384_s6 = sld [smem:[#allocation30_spill]]  ;;  %s3564_s26 = sshll.u32 %s701_s15, 4  ;;  %s3565_s26 = int_to_ptr.vmem [resolvable:$true] %s3564_s26 }
 0xde5   : > { %s4507_s20 = scalar_lea.vmem %s3565_s26, 128  ;;  %s4624_s27 = smov [#allocation3]  }
 0xde6   : > { %p4508_p2 = scmp.ne.s32.totalorder %s3565_s26, %s4507_s20  ;;  %s4511_s3 = sshll.u32 %s4624_s27, 4  ;;  %s4512_s3 = int_to_ptr.vmem [resolvable:$false] %s4511_s3 }
 0xde7   : > { %s4513_s8 = scalar_lea.vmem %s4512_s3, 256  ;;  %p4514_p6 = scmp.lt.s32.totalorder %s3565_s26, %s4512_s3 }
 0xde8   : > { %p4509_p4 = pnand %p4508_p2, %p4764_p3  ;;  %p4515_p7 = scmp.lt.s32.totalorder %s4513_s8, %s4507_s20 }
 0xde9   : > { %s3972_s28 = sshll.u32 %s5381_s22, 7  ;;  %s5385_s25 = sand.u32 1, %s5382_s23  }
 0xdea   : > { %s5253_s0 = scalar_lea.hbm %s5384_s6, %s3972_s28  ;;  %s3551_s16 = scalar_lea.sflag [#allocation4], %s5385_s25 }
 0xdeb   : > { %p4510_p5 = pneg %p4509_p4  ;;  %p4516_p8 = por %p4515_p7, %p4514_p6 }
 0xded   : > { %p4517_p10 = pnand %p4516_p8, %p4510_p5 }
 0xdef   : > { %4520 = shalt.err (!%p4517_p10)
}
 0xdf0   : > { %s4521_s29 = scalar_lea.hbm %s5253_s0, 128  ;;  %s4525_s9 = scalar_lea.hbm %s5384_s6, 256 }
 0xdf1   : > { %p4522_p11 = scmp.ne.s32.totalorder %s5253_s0, %s4521_s29  ;;  %p4526_p0 = scmp.lt.u32.totalorder %s5253_s0, %s5384_s6 }
 0xdf2   : > { %p4527_p1 = scmp.lt.u32.totalorder %s4525_s9, %s4521_s29  ;;  %p4529_p4 = scmp.lt.u32.totalorder %s4521_s29, %s5253_s0 }
 0xdf3   : > { %p4523_p12 = pnand %p4522_p11, %p4764_p3 }
 0xdf4   : > { %p4528_p2 = por %p4527_p1, %p4526_p0 }
 0xdf5   : > { %p4524_p13 = pneg %p4523_p12 }
 0xdf6   : > { %p4530_p5 = por %p4529_p4, %p4528_p2 }
 0xdf8   : > { %p4531_p6 = pnand %p4530_p5, %p4524_p13 }
 0xdfa   : > { %4534 = shalt.err (!%p4531_p6)
}
 0xdfb   : > { %4260 = dma.vmem_to_hbm [thread:$0]  (%p4764_p3), %s3565_s26, 128, %s5253_s0, %s3551_s16  }
 0xdfc PF: > { %s5386_s24 = sld [smem:[#allocation13_spill]]  ;;  %s5387_s21 = sld [smem:[#allocation6_spill]] }
 0xe02   : > { %p4266_p7 = scmp.ge.s32.totalorder %s5386_s24, 2  ;;  %s3576_s22 = sand.u32 1, %s5387_s21  }
 0xe03   : > { %s3577_s23 = scalar_lea.sflag [#allocation4], %s3576_s22 }
 0xe04   : > { %p4263_p8 = pnand %p4266_p7, %p4774_p9 }
 0xe06   : > { %4568 = dma.done.wait (!%p4263_p8), %s3577_s23, 128  }
 0xe07   : > { %4570 = vsyncadd (!%p4263_p8), %s3577_s23, 4294967168  ;;  %s30_s30 = sadd.s32 1, %s5386_s24   ;;  %s5389_s24 = sld [smem:[#allocation7_spill]] }
 0xe08   : > { %p27_p10 = scmp.ge.s32.totalorder %s30_s30, 6   ;;  %s5390_s25 = sld [smem:[#allocation8_spill]] }
 0xe09   : > { %s5391_s26 = sld [smem:[#allocation18_spill]]  ;;  %s5392_s27 = sld [smem:[#allocation11_spill]] }
 0xe0a   : > { %s5393_s28 = sld [smem:[#allocation12_spill]]  ;;  %s5394_s29 = sld [smem:[#allocation14_spill]] }
 0xe0b   : > { %s5395_s0 = sld [smem:[#allocation16_spill]]  ;;  %29 = sbr.rel (!%p27_p10) target bundleno = 18 (0x12), region = 167 }
 0xe12   :  { %3582 = vsyncpa [#allocation4], 1 }
 0xe13   :  { %3584 = vsyncpa [#allocation4 + $0x1], 1 }

</bundles_post_ra>
